<compile_context>
chip_gen: v7x
topology: tpu7x:2x2x1
jax: 0.10.0
libtpu: 0.0.40
codegen_flags: <defaults>
</compile_context>

<pallas_src>
import jax
import jax.numpy as jnp
from jax.experimental import pallas as pl
from jax.experimental.pallas import tpu as pltpu


def _stratified_kernel(z3_ref, sel_ref, o_ref, d_ref, pts_ref):
    # z3_ref:  (1, 3P)   interleaved depths: z3[3k+c] = z[k]
    # sel_ref: (1, 3P)   channel id per lane: sel[3k+c] = c
    # o_ref:   (TN, 3)   ray origins tile
    # d_ref:   (TN, 3)   pre-normalized ray directions tile
    # pts_ref: (TN, 3P)  sample points, interleaved per ray: [x0,y0,z0,x1,y1,z1,...]
    z3 = z3_ref[...]                       # (1, 3P)
    sel = sel_ref[...]                     # (1, 3P) int32
    o = o_ref[...]                         # (TN, 3)
    dn = d_ref[...]                        # (TN, 3)

    # Per-channel candidate rows: (TN, 1) column broadcast against lane-dense (1, 3P).
    v0 = o[:, 0:1] + dn[:, 0:1] * z3       # (TN, 3P)
    v1 = o[:, 1:2] + dn[:, 1:2] * z3
    v2 = o[:, 2:3] + dn[:, 2:3] * z3

    # Lane-select the correct channel -> final interleaved layout, stored lane-dense.
    pts_ref[...] = jnp.where(sel == 0, v0, jnp.where(sel == 1, v1, v2))


def _pick_tile_n(n, want):
    """Largest multiple-of-8 divisor of n that is <= want; falls back to n (one tile)."""
    want = max(8, min(want, n))
    t = (want // 8) * 8
    while t >= 8:
        if n % t == 0:
            return t
        t -= 8
    return n  # block dim == full array dim is always a legal BlockSpec


def stratified_raysampler(origins, directions, n_pts_per_ray, min_depth, max_depth,
                          tile_n=1024):
    """Returns (sample_points (N, P, 3), sample_lengths (N, P, 1)) in float32."""
    N = origins.shape[0]
    P = n_pts_per_ray
    assert origins.shape == (N, 3) and directions.shape == (N, 3)

    o = origins.astype(jnp.float32)
    d = directions.astype(jnp.float32)

    # Tiny (N, 3) glue stays in plain JAX: exact F.normalize semantics.
    norm = jnp.sqrt(jnp.sum(d * d, axis=1, keepdims=True))
    dn = d / jnp.maximum(norm, jnp.float32(1e-12))

    # Depths (matches torch.linspace incl. endpoint) + interleaved helper rows.
    z = jnp.linspace(min_depth, max_depth, P, dtype=jnp.float32)     # (P,)
    z3 = jnp.repeat(z, 3).reshape(1, 3 * P)                          # z3[3k+c] = z[k]
    sel = (jnp.arange(3 * P, dtype=jnp.int32) % 3).reshape(1, 3 * P) # sel[3k+c] = c

    tn = _pick_tile_n(N, tile_n)
    grid = (N // tn,)

    pts_flat = pl.pallas_call(
        _stratified_kernel,
        out_shape=jax.ShapeDtypeStruct((N, 3 * P), jnp.float32),
        grid_spec=pltpu.PrefetchScalarGridSpec(
            num_scalar_prefetch=0,
            grid=grid,
            in_specs=[
                pl.BlockSpec((1, 3 * P), lambda i: (0, 0)),   # z3 (constant row)
                pl.BlockSpec((1, 3 * P), lambda i: (0, 0)),   # channel selector
                pl.BlockSpec((tn, 3), lambda i: (i, 0)),      # origins
                pl.BlockSpec((tn, 3), lambda i: (i, 0)),      # normalized directions
            ],
            out_specs=pl.BlockSpec((tn, 3 * P), lambda i: (i, 0)),
        ),
        compiler_params=pltpu.CompilerParams(
            dimension_semantics=("parallel",)),
    )(z3, sel, o, dn)

    # Free reshape: row n is [x0,y0,z0, x1,y1,z1, ...] == row-major (P, 3).
    sample_points = pts_flat.reshape(N, P, 3)
    # Lengths are a pure broadcast of z; keep it out of the kernel (XLA fuses/streams it).
    sample_lengths = jnp.broadcast_to(z.reshape(1, P, 1), (N, P, 1))
    return sample_points, sample_lengths


def _reference(origins, directions, P, min_depth, max_depth):
    z = jnp.linspace(min_depth, max_depth, P, dtype=jnp.float32)
    norm = jnp.sqrt(jnp.sum(directions * directions, axis=1, keepdims=True))
    dn = directions / jnp.maximum(norm, 1e-12)
    pts = origins[:, None, :] + dn[:, None, :] * z[None, :, None]
    lens = jnp.broadcast_to(z[None, :, None], (origins.shape[0], P, 1))
    return pts, lens


if __name__ == "__main__":
    # cfg: n_pts_per_ray=64, min_depth=0.1, max_depth=5.0
    N, P = 256, 64
    min_depth, max_depth = 0.1, 5.0

    key = jax.random.PRNGKey(0)
    k_o, k_d = jax.random.split(key)
    origins = jax.random.normal(k_o, (N, 3), dtype=jnp.float32)
    directions = jax.random.normal(k_d, (N, 3), dtype=jnp.float32)

    pts, lens = stratified_raysampler(origins, directions, P, min_depth, max_depth)
    jax.block_until_ready((pts, lens))

    ref_pts, ref_lens = _reference(origins, directions, P, min_depth, max_depth)
    assert pts.shape == (N, P, 3) and lens.shape == (N, P, 1)
    assert jnp.allclose(pts, ref_pts, rtol=1e-6, atol=1e-6)
    assert jnp.allclose(lens, ref_lens, rtol=1e-6, atol=1e-6)

    print("KERNEL_OK")
</pallas_src>

<mosaic_0001>
module attributes {stable_mosaic.version = 11 : i64} {
  func.func @_stratified_kernel(%arg0: i32, %arg1: memref<1x192xf32, #tpu.memory_space<vmem>>, %arg2: memref<1x192xi32, #tpu.memory_space<vmem>>, %arg3: memref<256x3xf32, #tpu.memory_space<vmem>>, %arg4: memref<256x3xf32, #tpu.memory_space<vmem>>, %arg5: memref<256x192xf32, #tpu.memory_space<vmem>>) attributes {dimension_semantics = [#tpu.dimension_semantics<parallel>], iteration_bounds = array<i64: 1>, scalar_prefetch = 0 : i64, scratch_operands = 0 : i64, tpu.core_type = #tpu.core_type<tc>, window_params = [{pipeline_mode = #tpu.pipeline_mode<synchronous>, transform_indices = @transform_0, window_bounds = array<i64: 1, 192>}, {pipeline_mode = #tpu.pipeline_mode<synchronous>, transform_indices = @transform_1, window_bounds = array<i64: 1, 192>}, {transform_indices = @transform_2, window_bounds = array<i64: 256, 3>}, {transform_indices = @transform_3, window_bounds = array<i64: 256, 3>}, {transform_indices = @transform_4, window_bounds = array<i64: 256, 192>}]} {
    %c0 = arith.constant 0 : index
    %c0_0 = arith.constant 0 : index
    %0 = vector.load %arg1[%c0, %c0_0] : memref<1x192xf32, #tpu.memory_space<vmem>>, vector<1x192xf32>
    %c0_1 = arith.constant 0 : index
    %c0_2 = arith.constant 0 : index
    %1 = vector.load %arg2[%c0_1, %c0_2] : memref<1x192xi32, #tpu.memory_space<vmem>>, vector<1x192xi32>
    %c0_3 = arith.constant 0 : index
    %c0_4 = arith.constant 0 : index
    %2 = vector.load %arg3[%c0_3, %c0_4] : memref<256x3xf32, #tpu.memory_space<vmem>>, vector<256x3xf32>
    %c0_5 = arith.constant 0 : index
    %c0_6 = arith.constant 0 : index
    %3 = vector.load %arg4[%c0_5, %c0_6] : memref<256x3xf32, #tpu.memory_space<vmem>>, vector<256x3xf32>
    %4 = vector.extract_strided_slice %2 {offsets = [0, 0], sizes = [256, 1], strides = [1, 1]} : vector<256x3xf32> to vector<256x1xf32>
    %5 = vector.extract_strided_slice %3 {offsets = [0, 0], sizes = [256, 1], strides = [1, 1]} : vector<256x3xf32> to vector<256x1xf32>
    %6 = vector.broadcast %5 : vector<256x1xf32> to vector<256x192xf32>
    %7 = vector.broadcast %0 : vector<1x192xf32> to vector<256x192xf32>
    %8 = arith.mulf %6, %7 : vector<256x192xf32>
    %9 = vector.broadcast %4 : vector<256x1xf32> to vector<256x192xf32>
    %10 = arith.addf %9, %8 : vector<256x192xf32>
    %11 = vector.extract_strided_slice %2 {offsets = [0, 1], sizes = [256, 1], strides = [1, 1]} : vector<256x3xf32> to vector<256x1xf32>
    %12 = vector.extract_strided_slice %3 {offsets = [0, 1], sizes = [256, 1], strides = [1, 1]} : vector<256x3xf32> to vector<256x1xf32>
    %13 = vector.broadcast %12 : vector<256x1xf32> to vector<256x192xf32>
    %14 = vector.broadcast %0 : vector<1x192xf32> to vector<256x192xf32>
    %15 = arith.mulf %13, %14 : vector<256x192xf32>
    %16 = vector.broadcast %11 : vector<256x1xf32> to vector<256x192xf32>
    %17 = arith.addf %16, %15 : vector<256x192xf32>
    %18 = vector.extract_strided_slice %2 {offsets = [0, 2], sizes = [256, 1], strides = [1, 1]} : vector<256x3xf32> to vector<256x1xf32>
    %19 = vector.extract_strided_slice %3 {offsets = [0, 2], sizes = [256, 1], strides = [1, 1]} : vector<256x3xf32> to vector<256x1xf32>
    %20 = vector.broadcast %19 : vector<256x1xf32> to vector<256x192xf32>
    %21 = vector.broadcast %0 : vector<1x192xf32> to vector<256x192xf32>
    %22 = arith.mulf %20, %21 : vector<256x192xf32>
    %23 = vector.broadcast %18 : vector<256x1xf32> to vector<256x192xf32>
    %24 = arith.addf %23, %22 : vector<256x192xf32>
    %c0_i32 = arith.constant 0 : i32
    %25 = vector.broadcast %c0_i32 : i32 to vector<1x192xi32>
    %26 = arith.cmpi eq, %1, %25 : vector<1x192xi32>
    %c1_i32 = arith.constant 1 : i32
    %27 = vector.broadcast %c1_i32 : i32 to vector<1x192xi32>
    %28 = arith.cmpi eq, %1, %27 : vector<1x192xi32>
    %29 = vector.shape_cast %28 : vector<1x192xi1> to vector<1x192xi1>
    %30 = vector.broadcast %29 : vector<1x192xi1> to vector<256x192xi1>
    %31 = arith.select %30, %17, %24 : vector<256x192xi1>, vector<256x192xf32>
    %32 = vector.shape_cast %26 : vector<1x192xi1> to vector<1x192xi1>
    %33 = vector.broadcast %32 : vector<1x192xi1> to vector<256x192xi1>
    %34 = arith.select %33, %10, %31 : vector<256x192xi1>, vector<256x192xf32>
    %c0_7 = arith.constant 0 : index
    %c0_8 = arith.constant 0 : index
    %35 = vector.load %arg5[%c0_7, %c0_8] : memref<256x192xf32, #tpu.memory_space<vmem>>, vector<256x192xf32>
    tpu.vector_store %arg5[%c0_7, %c0_8], %34 {strides = array<i32>} : memref<256x192xf32, #tpu.memory_space<vmem>>, vector<256x192xf32>,
    return
  }
  func.func @transform_0(%arg0: i32) -> (i32, i32) {
    %c0_i32 = arith.constant 0 : i32
    %c0_i32_0 = arith.constant 0 : i32
    %c0_i32_1 = arith.constant 0 : i32
    return %c0_i32, %c0_i32_0 : i32, i32
  }
  func.func @transform_1(%arg0: i32) -> (i32, i32) {
    %c0_i32 = arith.constant 0 : i32
    %c0_i32_0 = arith.constant 0 : i32
    %c0_i32_1 = arith.constant 0 : i32
    return %c0_i32, %c0_i32_0 : i32, i32
  }
  func.func @transform_2(%arg0: i32) -> (i32, i32) {
    %c0_i32 = arith.constant 0 : i32
    %c0_i32_0 = arith.constant 0 : i32
    return %arg0, %c0_i32 : i32, i32
  }
  func.func @transform_3(%arg0: i32) -> (i32, i32) {
    %c0_i32 = arith.constant 0 : i32
    %c0_i32_0 = arith.constant 0 : i32
    return %arg0, %c0_i32 : i32, i32
  }
  func.func @transform_4(%arg0: i32) -> (i32, i32) {
    %c0_i32 = arith.constant 0 : i32
    %c0_i32_0 = arith.constant 0 : i32
    return %arg0, %c0_i32 : i32, i32
  }
}

</mosaic_0001>

<bundles_post_ra>
// kernel: tpu_custom_call.1
= control target key start
LH: loop header
LB: loop body
LE: loop exit
PB: predicated region body
PF: predicated region fallthrough
CT: control target
= control target key end

     0   :  { %v4175_v0 = vmov 0   ;;  %vm1463_vm6 = vcmask 523264   ;;  %s4170_s3 = inlined_call_operand.vmem [shape: f32[256,3], index: 3, kind: input, shape index: {}]   ;;  %s4171_s2 = inlined_call_operand.vmem [shape: f32[256,3], index: 2, kind: input, shape index: {}]   ;;  %s4172_s0 = inlined_call_operand.vmem [shape: f32[1,192], index: 0, kind: input, shape index: {}]   ;;  %s4173_s1 = inlined_call_operand.vmem [shape: s32[1,192], index: 1, kind: input, shape index: {}]   ;;  %s4174_s4 = inlined_call_operand.vmem [shape: f32[256,192], index: 4, kind: output, shape index: {}]  }
   0x1   :  { %1535 = vset.pattern.permute.xlu1 %v4175_v0  ;;  %1534 = vset.pattern.permute.xlu0 %v4175_v0  ;;  %v1573_v1 = vld [vmem:[%s4170_s3 + $0x10] sm:$0xff]  ;;  %v1578_v2 = vld [vmem:[%s4170_s3] sm:$0xff]  ;;  %v1585_v3 = vld [vmem:[%s4170_s3 + $0x18] sm:$0xff] }
   0x2   :  { %95 = vperm.xlu1 %1535, %v1573_v1   ;;  %85 = vperm.xlu0 %1534, %v1578_v2   ;;  %v1590_v4 = vld [vmem:[%s4170_s3 + $0x8] sm:$0xff]  ;;  %v1602_v6 = vld [vmem:[%s4170_s3 + $0x20] sm:$0xff]  ;;  %v1609_v7 = vld [vmem:[%s4170_s3 + $0x38] sm:$0xff] }
   0x3   :  { %v1597_v5 = vld [vmem:[%s4170_s3 + $0x28] sm:$0xff]  ;;  %v1614_v8 = vld [vmem:[%s4170_s3 + $0x30] sm:$0xff]  ;;  %v1626_v10 = vld [vmem:[%s4170_s3 + $0x40] sm:$0xff] }
   0x4   :  { %v1621_v9 = vld [vmem:[%s4170_s3 + $0x48] sm:$0xff]  ;;  %v1633_v11 = vld [vmem:[%s4170_s3 + $0x58] sm:$0xff]  ;;  %v1638_v12 = vld [vmem:[%s4170_s3 + $0x50] sm:$0xff] }
   0x5   :  { %v1645_v13 = vld [vmem:[%s4170_s3 + $0x68] sm:$0xff]  ;;  %v1650_v14 = vld [vmem:[%s4170_s3 + $0x60] sm:$0xff]  ;;  %v1657_v15 = vld [vmem:[%s4170_s3 + $0x78] sm:$0xff] }
   0x6   :  { %100 = vperm.xlu1 %1535, %v1585_v3   ;;  %90 = vperm.xlu0 %1534, %v1590_v4   ;;  %v1662_v16 = vld [vmem:[%s4170_s3 + $0x70] sm:$0xff]  ;;  %v1669_v17 = vld [vmem:[%s4170_s3 + $0x88] sm:$0xff]  ;;  %v1674_v18 = vld [vmem:[%s4170_s3 + $0x80] sm:$0xff] }
   0x7   :  { %v1681_v19 = vld [vmem:[%s4170_s3 + $0x98] sm:$0xff]  ;;  %v1686_v20 = vld [vmem:[%s4170_s3 + $0x90] sm:$0xff]  ;;  %v1693_v21 = vld [vmem:[%s4170_s3 + $0xa8] sm:$0xff] }
   0x8   :  { %v1698_v22 = vld [vmem:[%s4170_s3 + $0xa0] sm:$0xff]  ;;  %v1705_v23 = vld [vmem:[%s4170_s3 + $0xb8] sm:$0xff]  ;;  %v1710_v24 = vld [vmem:[%s4170_s3 + $0xb0] sm:$0xff] }
   0x9   :  { %v1717_v25 = vld [vmem:[%s4170_s3 + $0xc8] sm:$0xff]  ;;  %v1722_v26 = vld [vmem:[%s4170_s3 + $0xc0] sm:$0xff]  ;;  %v1729_v27 = vld [vmem:[%s4170_s3 + $0xd8] sm:$0xff] }
   0xa   :  { %110 = vperm.xlu1 %1535, %v1597_v5   ;;  %105 = vperm.xlu0 %1534, %v1602_v6   ;;  %v1734_v28 = vld [vmem:[%s4170_s3 + $0xd0] sm:$0xff]  ;;  %v1741_v29 = vld [vmem:[%s4170_s3 + $0xe8] sm:$0xff]  ;;  %v1746_v30 = vld [vmem:[%s4170_s3 + $0xe0] sm:$0xff] }
   0xb   :  { %v1753_v31 = vld [vmem:[%s4170_s3 + $0xf8] sm:$0xff]  ;;  %v1758_v32 = vld [vmem:[%s4170_s3 + $0xf0] sm:$0xff]  ;;  %v1765_v33 = vld [vmem:[%s4171_s2 + $0x8] sm:$0xff] }
   0xc   :  { %v1770_v34 = vld [vmem:[%s4171_s2] sm:$0xff]  ;;  %v1777_v35 = vld [vmem:[%s4171_s2 + $0x18] sm:$0xff]  ;;  %v1782_v36 = vld [vmem:[%s4171_s2 + $0x10] sm:$0xff] }
   0xd   :  { %v1789_v37 = vld [vmem:[%s4171_s2 + $0x28] sm:$0xff]  ;;  %v1794_v38 = vld [vmem:[%s4171_s2 + $0x20] sm:$0xff]  ;;  %v1801_v39 = vld [vmem:[%s4171_s2 + $0x38] sm:$0xff] }
   0xe   :  { %120 = vperm.xlu1 %1535, %v1609_v7   ;;  %115 = vperm.xlu0 %1534, %v1614_v8   ;;  %v1806_v40 = vld [vmem:[%s4171_s2 + $0x30] sm:$0xff]  ;;  %v1813_v41 = vld [vmem:[%s4171_s2 + $0x48] sm:$0xff]  ;;  %v1818_v42 = vld [vmem:[%s4171_s2 + $0x40] sm:$0xff] }
   0xf   :  { %v1825_v43 = vld [vmem:[%s4171_s2 + $0x58] sm:$0xff]  ;;  %v1830_v44 = vld [vmem:[%s4171_s2 + $0x50] sm:$0xff]  ;;  %v1837_v45 = vld [vmem:[%s4171_s2 + $0x68] sm:$0xff] }
  0x10   :  { %v1842_v46 = vld [vmem:[%s4171_s2 + $0x60] sm:$0xff]  ;;  %v1849_v47 = vld [vmem:[%s4171_s2 + $0x78] sm:$0xff]  ;;  %v1854_v48 = vld [vmem:[%s4171_s2 + $0x70] sm:$0xff] }
  0x11   :  { %v1861_v49 = vld [vmem:[%s4171_s2 + $0x88] sm:$0xff]  ;;  %v1866_v50 = vld [vmem:[%s4171_s2 + $0x80] sm:$0xff]  ;;  %v1873_v51 = vld [vmem:[%s4171_s2 + $0x98] sm:$0xff] }
  0x12   :  { %130 = vperm.xlu1 %1535, %v1621_v9   ;;  %125 = vperm.xlu0 %1534, %v1626_v10   ;;  %4360 = vst [vmem:[#allocation2_spill] sm:$0xff] %v1873_v51  ;;  %v1878_v52 = vld [vmem:[%s4171_s2 + $0x90] sm:$0xff]  ;;  %v1885_v53 = vld [vmem:[%s4171_s2 + $0xa8] sm:$0xff]  ;;  %v1890_v54 = vld [vmem:[%s4171_s2 + $0xa0] sm:$0xff] }
  0x13   :  { %4361 = vst [vmem:[#allocation3_spill] sm:$0xff] %v1885_v53  ;;  %v1897_v55 = vld [vmem:[%s4171_s2 + $0xb8] sm:$0xff]  ;;  %v1902_v56 = vld [vmem:[%s4171_s2 + $0xb0] sm:$0xff]  ;;  %v1909_v57 = vld [vmem:[%s4171_s2 + $0xc8] sm:$0xff] }
  0x14   :  { %4362 = vst [vmem:[#allocation4_spill] sm:$0xff] %v1897_v55  ;;  %4363 = vst [vmem:[#allocation5_spill] sm:$0xff] %v1902_v56  ;;  %v1914_v58 = vld [vmem:[%s4171_s2 + $0xc0] sm:$0xff]  ;;  %v1921_v59 = vld [vmem:[%s4171_s2 + $0xd8] sm:$0xff] }
  0x15   :  { %4364 = vst [vmem:[#allocation6_spill] sm:$0xff] %v1909_v57  ;;  %4365 = vst [vmem:[#allocation7_spill] sm:$0xff] %v1914_v58  ;;  %v1926_v60 = vld [vmem:[%s4171_s2 + $0xd0] sm:$0xff]  ;;  %v1933_v61 = vld [vmem:[%s4171_s2 + $0xe8] sm:$0xff] }
  0x16   :  { %140 = vperm.xlu1 %1535, %v1633_v11   ;;  %135 = vperm.xlu0 %1534, %v1638_v12   ;;  %4366 = vst [vmem:[#allocation8_spill] sm:$0xff] %v1921_v59  ;;  %4367 = vst [vmem:[#allocation9_spill] sm:$0xff] %v1926_v60  ;;  %v1938_v62 = vld [vmem:[%s4171_s2 + $0xe0] sm:$0xff]  ;;  %v1945_v63 = vld [vmem:[%s4171_s2 + $0xf8] sm:$0xff] }
  0x17   :  { %4368 = vst [vmem:[#allocation10_spill] sm:$0xff] %v1933_v61  ;;  %4369 = vst [vmem:[#allocation11_spill] sm:$0xff] %v1938_v62  ;;  %v1950_v0 = vld [vmem:[%s4171_s2 + $0xf0] sm:$0xff] }
  0x18   :  { %4370 = vst [vmem:[#allocation12_spill] sm:$0xff] %v1945_v63 }
  0x1a   :  { %150 = vperm.xlu1 %1535, %v1645_v13   ;;  %145 = vperm.xlu0 %1534, %v1650_v14  }
  0x1e   :  { %160 = vperm.xlu1 %1535, %v1657_v15   ;;  %155 = vperm.xlu0 %1534, %v1662_v16  }
  0x22   :  { %170 = vperm.xlu1 %1535, %v1669_v17   ;;  %165 = vperm.xlu0 %1534, %v1674_v18  }
  0x26   :  { %180 = vperm.xlu1 %1535, %v1681_v19   ;;  %175 = vperm.xlu0 %1534, %v1686_v20  }
  0x2a   :  { %190 = vperm.xlu1 %1535, %v1693_v21   ;;  %185 = vperm.xlu0 %1534, %v1698_v22  }
  0x2e   :  { %200 = vperm.xlu1 %1535, %v1705_v23   ;;  %195 = vperm.xlu0 %1534, %v1710_v24  }
  0x32   :  { %210 = vperm.xlu1 %1535, %v1717_v25   ;;  %205 = vperm.xlu0 %1534, %v1722_v26  }
  0x36   :  { %220 = vperm.xlu1 %1535, %v1729_v27   ;;  %215 = vperm.xlu0 %1534, %v1734_v28  }
  0x3a   :  { %230 = vperm.xlu1 %1535, %v1741_v29   ;;  %225 = vperm.xlu0 %1534, %v1746_v30  }
  0x3e   :  { %240 = vperm.xlu1 %1535, %v1753_v31   ;;  %235 = vperm.xlu0 %1534, %v1758_v32  }
  0x42   :  { %325 = vperm.xlu1 %1535, %v1765_v33   ;;  %320 = vperm.xlu0 %1534, %v1770_v34  }
  0x46   :  { %335 = vperm.xlu1 %1535, %v1777_v35   ;;  %330 = vperm.xlu0 %1534, %v1782_v36  }
  0x4a   :  { %345 = vperm.xlu1 %1535, %v1789_v37   ;;  %340 = vperm.xlu0 %1534, %v1794_v38  }
  0x4e   :  { %355 = vperm.xlu1 %1535, %v1801_v39   ;;  %350 = vperm.xlu0 %1534, %v1806_v40  }
  0x52   :  { %365 = vperm.xlu1 %1535, %v1813_v41   ;;  %360 = vperm.xlu0 %1534, %v1818_v42  }
  0x56   :  { %375 = vperm.xlu1 %1535, %v1825_v43   ;;  %370 = vperm.xlu0 %1534, %v1830_v44  }
  0x5a   :  { %385 = vperm.xlu1 %1535, %v1837_v45   ;;  %380 = vperm.xlu0 %1534, %v1842_v46  }
  0x5e   :  { %395 = vperm.xlu1 %1535, %v1849_v47   ;;  %390 = vperm.xlu0 %1534, %v1854_v48  }
  0x62   :  { %405 = vperm.xlu1 %1535, %v1861_v49   ;;  %400 = vperm.xlu0 %1534, %v1866_v50  }
  0x66   :  { %415 = vperm.xlu1 %1535, %v1873_v51   ;;  %410 = vperm.xlu0 %1534, %v1878_v52  }
  0x6a   :  { %425 = vperm.xlu1 %1535, %v1885_v53   ;;  %420 = vperm.xlu0 %1534, %v1890_v54  }
  0x6e   :  { %435 = vperm.xlu1 %1535, %v1897_v55   ;;  %430 = vperm.xlu0 %1534, %v1902_v56  }
  0x72   :  { %445 = vperm.xlu1 %1535, %v1909_v57   ;;  %440 = vperm.xlu0 %1534, %v1914_v58  }
  0x76   :  { %455 = vperm.xlu1 %1535, %v1921_v59   ;;  %450 = vperm.xlu0 %1534, %v1926_v60  }
  0x7a   :  { %465 = vperm.xlu1 %1535, %v1933_v61   ;;  %460 = vperm.xlu0 %1534, %v1938_v62   ;;  %v1541_v61 = vmov 1  }
  0x7e   :  { %475 = vperm.xlu1 %1535, %v1945_v63   ;;  %470 = vperm.xlu0 %1534, %v1950_v0  }
  0x81   :  { %v1954_v59 = vpop.permute.xlu1 %95  ;;  %v1956_v60 = vpop.permute.xlu0 %85 }
  0x82   :  { %4371 = vst [vmem:[#allocation13_spill] sm:$0xff] %v1954_v59  ;;  %4372 = vst [vmem:[#allocation14_spill] sm:$0xff] %v1956_v60  ;;  %1537 = vset.pattern.permute.xlu1 %v1541_v61  ;;  %1536 = vset.pattern.permute.xlu0 %v1541_v61 }
  0x83   :  { %547 = vperm.xlu1 %1537, %v1590_v4   ;;  %543 = vperm.xlu0 %1536, %v1578_v2  }
  0x85   :  { %v1960_v62 = vpop.permute.xlu1 %100  ;;  %v1962_v57 = vpop.permute.xlu0 %90 }
  0x86   :  { %4373 = vst [vmem:[#allocation15_spill] sm:$0xff] %v1960_v62  ;;  %4374 = vst [vmem:[#allocation16_spill] sm:$0xff] %v1962_v57 }
  0x87   :  { %551 = vperm.xlu1 %1537, %v1573_v1   ;;  %555 = vperm.xlu0 %1536, %v1585_v3  }
  0x89   :  { %v1966_v63 = vpop.permute.xlu1 %110  ;;  %v1968_v59 = vpop.permute.xlu0 %105 }
  0x8a   :  { %4375 = vst [vmem:[#allocation17_spill] sm:$0xff] %v1966_v63  ;;  %4376 = vst [vmem:[#allocation18_spill] sm:$0xff] %v1968_v59 }
  0x8b   :  { %559 = vperm.xlu1 %1537, %v1602_v6   ;;  %563 = vperm.xlu0 %1536, %v1597_v5  }
  0x8d   :  { %v1972_v61 = vpop.permute.xlu1 %120  ;;  %v1974_v60 = vpop.permute.xlu0 %115 }
  0x8e   :  { %4377 = vst [vmem:[#allocation19_spill] sm:$0xff] %v1972_v61  ;;  %4378 = vst [vmem:[#allocation20_spill] sm:$0xff] %v1974_v60 }
  0x8f   :  { %567 = vperm.xlu1 %1537, %v1614_v8   ;;  %571 = vperm.xlu0 %1536, %v1609_v7  }
  0x91   :  { %v1978_v57 = vpop.permute.xlu1 %130  ;;  %v1980_v62 = vpop.permute.xlu0 %125 }
  0x92   :  { %4379 = vst [vmem:[#allocation21_spill] sm:$0xff] %v1978_v57  ;;  %4380 = vst [vmem:[#allocation22_spill] sm:$0xff] %v1980_v62 }
  0x93   :  { %575 = vperm.xlu1 %1537, %v1626_v10   ;;  %579 = vperm.xlu0 %1536, %v1621_v9  }
  0x95   :  { %v1984_v59 = vpop.permute.xlu1 %140  ;;  %v1986_v63 = vpop.permute.xlu0 %135 }
  0x96   :  { %4381 = vst [vmem:[#allocation23_spill] sm:$0xff] %v1984_v59  ;;  %4382 = vst [vmem:[#allocation24_spill] sm:$0xff] %v1986_v63 }
  0x97   :  { %583 = vperm.xlu1 %1537, %v1638_v12   ;;  %587 = vperm.xlu0 %1536, %v1633_v11  }
  0x99   :  { %v1990_v60 = vpop.permute.xlu1 %150  ;;  %v1992_v61 = vpop.permute.xlu0 %145 }
  0x9a   :  { %4383 = vst [vmem:[#allocation25_spill] sm:$0xff] %v1990_v60  ;;  %4384 = vst [vmem:[#allocation26_spill] sm:$0xff] %v1992_v61 }
  0x9b   :  { %591 = vperm.xlu1 %1537, %v1650_v14   ;;  %595 = vperm.xlu0 %1536, %v1645_v13  }
  0x9d   :  { %v1996_v62 = vpop.permute.xlu1 %160  ;;  %v1998_v57 = vpop.permute.xlu0 %155 }
  0x9e   :  { %4385 = vst [vmem:[#allocation27_spill] sm:$0xff] %v1996_v62  ;;  %4386 = vst [vmem:[#allocation28_spill] sm:$0xff] %v1998_v57 }
  0x9f   :  { %599 = vperm.xlu1 %1537, %v1662_v16   ;;  %603 = vperm.xlu0 %1536, %v1657_v15  }
  0xa1   :  { %v2002_v63 = vpop.permute.xlu1 %170  ;;  %v2004_v59 = vpop.permute.xlu0 %165 }
  0xa2   :  { %4387 = vst [vmem:[#allocation29_spill] sm:$0xff] %v2002_v63  ;;  %4388 = vst [vmem:[#allocation30_spill] sm:$0xff] %v2004_v59 }
  0xa3   :  { %607 = vperm.xlu1 %1537, %v1674_v18   ;;  %611 = vperm.xlu0 %1536, %v1669_v17  }
  0xa5   :  { %v2008_v61 = vpop.permute.xlu1 %180  ;;  %v2010_v60 = vpop.permute.xlu0 %175 }
  0xa6   :  { %4389 = vst [vmem:[#allocation31_spill] sm:$0xff] %v2008_v61  ;;  %4390 = vst [vmem:[#allocation32_spill] sm:$0xff] %v2010_v60 }
  0xa7   :  { %615 = vperm.xlu1 %1537, %v1686_v20   ;;  %619 = vperm.xlu0 %1536, %v1681_v19  }
  0xa9   :  { %v2014_v57 = vpop.permute.xlu1 %190  ;;  %v2016_v62 = vpop.permute.xlu0 %185 }
  0xaa   :  { %4391 = vst [vmem:[#allocation33_spill] sm:$0xff] %v2014_v57  ;;  %4392 = vst [vmem:[#allocation34_spill] sm:$0xff] %v2016_v62 }
  0xab   :  { %623 = vperm.xlu1 %1537, %v1698_v22   ;;  %627 = vperm.xlu0 %1536, %v1693_v21  }
  0xad   :  { %v2020_v59 = vpop.permute.xlu1 %200  ;;  %v2022_v63 = vpop.permute.xlu0 %195 }
  0xae   :  { %4393 = vst [vmem:[#allocation35_spill] sm:$0xff] %v2020_v59  ;;  %4394 = vst [vmem:[#allocation36_spill] sm:$0xff] %v2022_v63 }
  0xaf   :  { %631 = vperm.xlu1 %1537, %v1710_v24   ;;  %635 = vperm.xlu0 %1536, %v1705_v23  }
  0xb1   :  { %v2026_v60 = vpop.permute.xlu1 %210  ;;  %v2028_v61 = vpop.permute.xlu0 %205 }
  0xb2   :  { %4395 = vst [vmem:[#allocation37_spill] sm:$0xff] %v2026_v60  ;;  %4396 = vst [vmem:[#allocation38_spill] sm:$0xff] %v2028_v61 }
  0xb3   :  { %639 = vperm.xlu1 %1537, %v1722_v26   ;;  %643 = vperm.xlu0 %1536, %v1717_v25  }
  0xb5   :  { %v2032_v62 = vpop.permute.xlu1 %220  ;;  %v2034_v57 = vpop.permute.xlu0 %215 }
  0xb6   :  { %4397 = vst [vmem:[#allocation39_spill] sm:$0xff] %v2032_v62  ;;  %4398 = vst [vmem:[#allocation40_spill] sm:$0xff] %v2034_v57 }
  0xb7   :  { %647 = vperm.xlu1 %1537, %v1734_v28   ;;  %651 = vperm.xlu0 %1536, %v1729_v27  }
  0xb9   :  { %v2038_v63 = vpop.permute.xlu1 %230  ;;  %v2040_v59 = vpop.permute.xlu0 %225 }
  0xba   :  { %4399 = vst [vmem:[#allocation41_spill] sm:$0xff] %v2038_v63  ;;  %4400 = vst [vmem:[#allocation42_spill] sm:$0xff] %v2040_v59 }
  0xbb   :  { %655 = vperm.xlu1 %1537, %v1746_v30   ;;  %659 = vperm.xlu0 %1536, %v1741_v29  }
  0xbd   :  { %v2044_v61 = vpop.permute.xlu1 %240  ;;  %v2046_v60 = vpop.permute.xlu0 %235 }
  0xbe   :  { %4401 = vst [vmem:[#allocation43_spill] sm:$0xff] %v2044_v61  ;;  %4402 = vst [vmem:[#allocation44_spill] sm:$0xff] %v2046_v60 }
  0xbf   :  { %663 = vperm.xlu1 %1537, %v1758_v32   ;;  %667 = vperm.xlu0 %1536, %v1753_v31  }
  0xc1   :  { %v2050_v57 = vpop.permute.xlu1 %325  ;;  %v2052_v62 = vpop.permute.xlu0 %320 }
  0xc2   :  { %4403 = vst [vmem:[#allocation45_spill] sm:$0xff] %v2050_v57  ;;  %4404 = vst [vmem:[#allocation46_spill] sm:$0xff] %v2052_v62 }
  0xc3   :  { %735 = vperm.xlu1 %1537, %v1770_v34   ;;  %739 = vperm.xlu0 %1536, %v1765_v33  }
  0xc5   :  { %v2056_v59 = vpop.permute.xlu1 %335  ;;  %v2058_v63 = vpop.permute.xlu0 %330 }
  0xc6   :  { %4405 = vst [vmem:[#allocation47_spill] sm:$0xff] %v2056_v59  ;;  %4406 = vst [vmem:[#allocation48_spill] sm:$0xff] %v2058_v63 }
  0xc7   :  { %743 = vperm.xlu1 %1537, %v1782_v36   ;;  %747 = vperm.xlu0 %1536, %v1777_v35  }
  0xc9   :  { %v2062_v61 = vpop.permute.xlu1 %345  ;;  %v2064_v60 = vpop.permute.xlu0 %340 }
  0xca   :  { %4407 = vst [vmem:[#allocation49_spill] sm:$0xff] %v2062_v61  ;;  %4408 = vst [vmem:[#allocation50_spill] sm:$0xff] %v2064_v60 }
  0xcb   :  { %751 = vperm.xlu1 %1537, %v1794_v38   ;;  %755 = vperm.xlu0 %1536, %v1789_v37  }
  0xcd   :  { %v2068_v62 = vpop.permute.xlu1 %355  ;;  %v2070_v57 = vpop.permute.xlu0 %350 }
  0xce   :  { %4409 = vst [vmem:[#allocation51_spill] sm:$0xff] %v2068_v62  ;;  %4410 = vst [vmem:[#allocation52_spill] sm:$0xff] %v2070_v57 }
  0xcf   :  { %759 = vperm.xlu1 %1537, %v1806_v40   ;;  %763 = vperm.xlu0 %1536, %v1801_v39  }
  0xd1   :  { %v2074_v63 = vpop.permute.xlu1 %365  ;;  %v2076_v59 = vpop.permute.xlu0 %360 }
  0xd2   :  { %4411 = vst [vmem:[#allocation53_spill] sm:$0xff] %v2074_v63  ;;  %4412 = vst [vmem:[#allocation54_spill] sm:$0xff] %v2076_v59 }
  0xd3   :  { %767 = vperm.xlu1 %1537, %v1818_v42   ;;  %771 = vperm.xlu0 %1536, %v1813_v41  }
  0xd5   :  { %v2080_v60 = vpop.permute.xlu1 %375  ;;  %v2082_v61 = vpop.permute.xlu0 %370 }
  0xd6   :  { %4413 = vst [vmem:[#allocation55_spill] sm:$0xff] %v2080_v60  ;;  %4414 = vst [vmem:[#allocation56_spill] sm:$0xff] %v2082_v61 }
  0xd7   :  { %775 = vperm.xlu1 %1537, %v1830_v44   ;;  %779 = vperm.xlu0 %1536, %v1825_v43  }
  0xd9   :  { %v2086_v57 = vpop.permute.xlu1 %385  ;;  %v2088_v62 = vpop.permute.xlu0 %380 }
  0xda   :  { %4415 = vst [vmem:[#allocation57_spill] sm:$0xff] %v2086_v57  ;;  %4416 = vst [vmem:[#allocation58_spill] sm:$0xff] %v2088_v62 }
  0xdb   :  { %783 = vperm.xlu1 %1537, %v1842_v46   ;;  %787 = vperm.xlu0 %1536, %v1837_v45  }
  0xdd   :  { %v2092_v59 = vpop.permute.xlu1 %395  ;;  %v2094_v63 = vpop.permute.xlu0 %390 }
  0xde   :  { %4417 = vst [vmem:[#allocation59_spill] sm:$0xff] %v2092_v59  ;;  %4418 = vst [vmem:[#allocation60_spill] sm:$0xff] %v2094_v63 }
  0xdf   :  { %791 = vperm.xlu1 %1537, %v1854_v48   ;;  %795 = vperm.xlu0 %1536, %v1849_v47  }
  0xe1   :  { %v2098_v61 = vpop.permute.xlu1 %405  ;;  %v2100_v60 = vpop.permute.xlu0 %400 }
  0xe2   :  { %4419 = vst [vmem:[#allocation61_spill] sm:$0xff] %v2098_v61  ;;  %4420 = vst [vmem:[#allocation62_spill] sm:$0xff] %v2100_v60 }
  0xe3   :  { %799 = vperm.xlu1 %1537, %v1866_v50   ;;  %803 = vperm.xlu0 %1536, %v1861_v49  }
  0xe5   :  { %v2104_v62 = vpop.permute.xlu1 %415  ;;  %v2106_v57 = vpop.permute.xlu0 %410 }
  0xe6   :  { %4421 = vst [vmem:[#allocation63_spill] sm:$0xff] %v2104_v62  ;;  %4422 = vst [vmem:[#allocation64_spill] sm:$0xff] %v2106_v57 }
  0xe7   :  { %807 = vperm.xlu1 %1537, %v1878_v52   ;;  %811 = vperm.xlu0 %1536, %v1873_v51  }
  0xe9   :  { %v2110_v63 = vpop.permute.xlu1 %425  ;;  %v2112_v59 = vpop.permute.xlu0 %420 }
  0xea   :  { %4423 = vst [vmem:[#allocation65_spill] sm:$0xff] %v2110_v63  ;;  %4424 = vst [vmem:[#allocation66_spill] sm:$0xff] %v2112_v59  ;;  %v4429_v63 = vld [vmem:[#allocation6_spill] sm:$0xff] }
  0xeb   :  { %815 = vperm.xlu1 %1537, %v1890_v54   ;;  %819 = vperm.xlu0 %1536, %v1885_v53   ;;  %v4432_v53 = vld [vmem:[#allocation9_spill] sm:$0xff] }
  0xed   :  { %v2116_v60 = vpop.permute.xlu1 %435  ;;  %v2118_v61 = vpop.permute.xlu0 %430 }
  0xee   :  { %4425 = vst [vmem:[#allocation67_spill] sm:$0xff] %v2116_v60  ;;  %4426 = vst [vmem:[#allocation68_spill] sm:$0xff] %v2118_v61  ;;  %v4433_v60 = vld [vmem:[#allocation8_spill] sm:$0xff] }
  0xef   :  { %823 = vperm.xlu1 %1537, %v1902_v56   ;;  %827 = vperm.xlu0 %1536, %v1897_v55   ;;  %v4436_v55 = vld [vmem:[#allocation11_spill] sm:$0xff] }
  0xf1   :  { %v2122_v57 = vpop.permute.xlu1 %445  ;;  %v2124_v62 = vpop.permute.xlu0 %440 }
  0xf2   :  { %4427 = vst [vmem:[#allocation69_spill] sm:$0xff] %v2122_v57  ;;  %4428 = vst [vmem:[#allocation70_spill] sm:$0xff] %v2124_v62  ;;  %v4437_v57 = vld [vmem:[#allocation10_spill] sm:$0xff] }
  0xf3   :  { %831 = vperm.xlu1 %1537, %v1914_v58   ;;  %835 = vperm.xlu0 %1536, %v4429_v63  }
  0xf5   :  { %v2128_v59 = vpop.permute.xlu1 %455  ;;  %v2130_v51 = vpop.permute.xlu0 %450 }
  0xf6   :  { %4430 = vst [vmem:[#allocation71_spill] sm:$0xff] %v2128_v59  ;;  %4431 = vst [vmem:[#allocation72_spill] sm:$0xff] %v2130_v51  ;;  %v4440_v59 = vld [vmem:[#allocation12_spill] sm:$0xff] }
  0xf7   :  { %839 = vperm.xlu1 %1537, %v4432_v53   ;;  %843 = vperm.xlu0 %1536, %v4433_v60   ;;  %v1542_v60 = vmov 2  }
  0xf9   :  { %v2134_v61 = vpop.permute.xlu1 %465  ;;  %v2136_v56 = vpop.permute.xlu0 %460 }
  0xfa   :  { %4434 = vst [vmem:[#allocation9_spill] sm:$0xff] %v2134_v61  ;;  %4435 = vst [vmem:[#allocation73_spill] sm:$0xff] %v2136_v56 }
  0xfb   :  { %847 = vperm.xlu1 %1537, %v4436_v55   ;;  %851 = vperm.xlu0 %1536, %v4437_v57  }
  0xfd   :  { %v2140_v62 = vpop.permute.xlu1 %475  ;;  %v2142_v58 = vpop.permute.xlu0 %470 }
  0xfe   :  { %4438 = vst [vmem:[#allocation11_spill] sm:$0xff] %v2140_v62  ;;  %4439 = vst [vmem:[#allocation10_spill] sm:$0xff] %v2142_v58 }
  0xff   :  { %855 = vperm.xlu1 %1537, %v1950_v0   ;;  %859 = vperm.xlu0 %1536, %v4440_v59  }
 0x102   :  { %v2146_v51 = vpop.permute.xlu1 %547  ;;  %v2148_v63 = vpop.permute.xlu0 %543 }
 0x103   :  { %4441 = vst [vmem:[#allocation12_spill] sm:$0xff] %v2146_v51  ;;  %4442 = vst [vmem:[#allocation74_spill] sm:$0xff] %v2148_v63  ;;  %1538 = vset.pattern.permute.xlu1 %v1542_v60  ;;  %1539 = vset.pattern.permute.xlu0 %v1542_v60 }
 0x104   :  { %927 = vperm.xlu1 %1538, %v1578_v2   ;;  %931 = vperm.xlu0 %1539, %v1590_v4  }
 0x106   :  { %v2152_v61 = vpop.permute.xlu1 %551  ;;  %v2154_v62 = vpop.permute.xlu0 %555 }
 0x107   :  { %4443 = vst [vmem:[#allocation75_spill] sm:$0xff] %v2152_v61  ;;  %4444 = vst [vmem:[#allocation76_spill] sm:$0xff] %v2154_v62  ;;  %v4557_v62 = vld [vmem:[#allocation40_spill] sm:$0xff] }
 0x108   :  { %935 = vperm.xlu1 %1538, %v1573_v1   ;;  %943 = vperm.xlu0 %1539, %v1602_v6  }
 0x10a   :  { %v2158_v58 = vpop.permute.xlu1 %559  ;;  %v2160_v51 = vpop.permute.xlu0 %563 }
 0x10b   :  { %4445 = vst [vmem:[#allocation77_spill] sm:$0xff] %v2158_v58  ;;  %4446 = vst [vmem:[#allocation78_spill] sm:$0xff] %v2160_v51 }
 0x10c   :  { %939 = vperm.xlu1 %1538, %v1585_v3   ;;  %951 = vperm.xlu0 %1539, %v1614_v8  }
 0x10e   :  { %v2164_v60 = vpop.permute.xlu1 %567  ;;  %v2166_v2 = vpop.permute.xlu0 %571 }
 0x10f   :  { %4447 = vst [vmem:[#allocation79_spill] sm:$0xff] %v2164_v60  ;;  %4448 = vst [vmem:[#allocation80_spill] sm:$0xff] %v2166_v2 }
 0x110   :  { %947 = vperm.xlu1 %1538, %v1597_v5   ;;  %959 = vperm.xlu0 %1539, %v1626_v10  }
 0x112   :  { %v2170_v4 = vpop.permute.xlu1 %575  ;;  %v2172_v1 = vpop.permute.xlu0 %579 }
 0x113   :  { %4449 = vst [vmem:[#allocation81_spill] sm:$0xff] %v2170_v4  ;;  %4450 = vst [vmem:[#allocation82_spill] sm:$0xff] %v2172_v1 }
 0x114   :  { %955 = vperm.xlu1 %1538, %v1609_v7   ;;  %967 = vperm.xlu0 %1539, %v1638_v12  }
 0x116   :  { %v2176_v6 = vpop.permute.xlu1 %583  ;;  %v2178_v3 = vpop.permute.xlu0 %587 }
 0x117   :  { %4451 = vst [vmem:[#allocation83_spill] sm:$0xff] %v2176_v6  ;;  %4452 = vst [vmem:[#allocation84_spill] sm:$0xff] %v2178_v3  ;;  %v4550_v6 = vld [vmem:[#allocation37_spill] sm:$0xff] }
 0x118   :  { %963 = vperm.xlu1 %1538, %v1621_v9   ;;  %975 = vperm.xlu0 %1539, %v1650_v14  }
 0x11a   :  { %v2182_v8 = vpop.permute.xlu1 %591  ;;  %v2184_v5 = vpop.permute.xlu0 %595 }
 0x11b   :  { %4453 = vst [vmem:[#allocation85_spill] sm:$0xff] %v2182_v8  ;;  %4454 = vst [vmem:[#allocation86_spill] sm:$0xff] %v2184_v5  ;;  %v4549_v8 = vld [vmem:[#allocation36_spill] sm:$0xff] }
 0x11c   :  { %971 = vperm.xlu1 %1538, %v1633_v11   ;;  %983 = vperm.xlu0 %1539, %v1662_v16  }
 0x11e   :  { %v2188_v10 = vpop.permute.xlu1 %599  ;;  %v2190_v7 = vpop.permute.xlu0 %603 }
 0x11f   :  { %4455 = vst [vmem:[#allocation87_spill] sm:$0xff] %v2188_v10  ;;  %4456 = vst [vmem:[#allocation88_spill] sm:$0xff] %v2190_v7  ;;  %v4548_v10 = vld [vmem:[#allocation35_spill] sm:$0xff] }
 0x120   :  { %979 = vperm.xlu1 %1538, %v1645_v13   ;;  %991 = vperm.xlu0 %1539, %v1674_v18  }
 0x122   :  { %v2194_v12 = vpop.permute.xlu1 %607  ;;  %v2196_v9 = vpop.permute.xlu0 %611 }
 0x123   :  { %4457 = vst [vmem:[#allocation89_spill] sm:$0xff] %v2194_v12  ;;  %4458 = vst [vmem:[#allocation90_spill] sm:$0xff] %v2196_v9 }
 0x124   :  { %987 = vperm.xlu1 %1538, %v1657_v15   ;;  %999 = vperm.xlu0 %1539, %v1686_v20  }
 0x126   :  { %v2200_v14 = vpop.permute.xlu1 %615  ;;  %v2202_v11 = vpop.permute.xlu0 %619 }
 0x127   :  { %4459 = vst [vmem:[#allocation91_spill] sm:$0xff] %v2200_v14  ;;  %4460 = vst [vmem:[#allocation92_spill] sm:$0xff] %v2202_v11  ;;  %v4545_v11 = vld [vmem:[#allocation32_spill] sm:$0xff] }
 0x128   :  { %995 = vperm.xlu1 %1538, %v1669_v17   ;;  %1007 = vperm.xlu0 %1539, %v1698_v22  }
 0x12a   :  { %v2206_v16 = vpop.permute.xlu1 %623  ;;  %v2208_v13 = vpop.permute.xlu0 %627 }
 0x12b   :  { %4461 = vst [vmem:[#allocation93_spill] sm:$0xff] %v2206_v16  ;;  %4462 = vst [vmem:[#allocation94_spill] sm:$0xff] %v2208_v13 }
 0x12c   :  { %1003 = vperm.xlu1 %1538, %v1681_v19   ;;  %1015 = vperm.xlu0 %1539, %v1710_v24  }
 0x12e   :  { %v2212_v18 = vpop.permute.xlu1 %631  ;;  %v2214_v15 = vpop.permute.xlu0 %635 }
 0x12f   :  { %4463 = vst [vmem:[#allocation95_spill] sm:$0xff] %v2212_v18  ;;  %4464 = vst [vmem:[#allocation96_spill] sm:$0xff] %v2214_v15 }
 0x130   :  { %1011 = vperm.xlu1 %1538, %v1693_v21   ;;  %1023 = vperm.xlu0 %1539, %v1722_v26  }
 0x132   :  { %v2218_v20 = vpop.permute.xlu1 %639  ;;  %v2220_v17 = vpop.permute.xlu0 %643 }
 0x133   :  { %4465 = vst [vmem:[#allocation97_spill] sm:$0xff] %v2218_v20  ;;  %4466 = vst [vmem:[#allocation98_spill] sm:$0xff] %v2220_v17 }
 0x134   :  { %1019 = vperm.xlu1 %1538, %v1705_v23   ;;  %1031 = vperm.xlu0 %1539, %v1734_v28  }
 0x136   :  { %v2224_v22 = vpop.permute.xlu1 %647  ;;  %v2226_v19 = vpop.permute.xlu0 %651 }
 0x137   :  { %4467 = vst [vmem:[#allocation99_spill] sm:$0xff] %v2224_v22  ;;  %4468 = vst [vmem:[#allocation100_spill] sm:$0xff] %v2226_v19  ;;  %v4540_v22 = vld [vmem:[#allocation29_spill] sm:$0xff] }
 0x138   :  { %1027 = vperm.xlu1 %1538, %v1717_v25   ;;  %1039 = vperm.xlu0 %1539, %v1746_v30  }
 0x13a   :  { %v2230_v24 = vpop.permute.xlu1 %655  ;;  %v2232_v21 = vpop.permute.xlu0 %659 }
 0x13b   :  { %4469 = vst [vmem:[#allocation101_spill] sm:$0xff] %v2230_v24  ;;  %v4539_v24 = vld [vmem:[#allocation28_spill] sm:$0xff] }
 0x13c   :  { %1035 = vperm.xlu1 %1538, %v1729_v27   ;;  %1047 = vperm.xlu0 %1539, %v1758_v32  }
 0x13e   :  { %v2236_v26 = vpop.permute.xlu1 %663  ;;  %v2238_v23 = vpop.permute.xlu0 %667 }
 0x13f   :  { %4470 = vst [vmem:[#allocation102_spill] sm:$0xff] %v2236_v26 }
 0x140   :  { %1043 = vperm.xlu1 %1538, %v1741_v29   ;;  %1119 = vperm.xlu0 %1539, %v1770_v34  }
 0x142   :  { %v2242_v28 = vpop.permute.xlu1 %735  ;;  %v2244_v25 = vpop.permute.xlu0 %739 }
 0x143   :  { %4471 = vst [vmem:[#allocation103_spill] sm:$0xff] %v2242_v28  ;;  %4472 = vst [vmem:[#allocation104_spill] sm:$0xff] %v2244_v25  ;;  %v4538_v28 = vld [vmem:[#allocation27_spill] sm:$0xff] }
 0x144   :  { %1051 = vperm.xlu1 %1538, %v1753_v31   ;;  %1127 = vperm.xlu0 %1539, %v1782_v36  }
 0x146   :  { %v2248_v30 = vpop.permute.xlu1 %743  ;;  %v2250_v27 = vpop.permute.xlu0 %747 }
 0x147   :  { %4473 = vst [vmem:[#allocation105_spill] sm:$0xff] %v2248_v30  ;;  %4474 = vst [vmem:[#allocation106_spill] sm:$0xff] %v2250_v27 }
 0x148   :  { %1123 = vperm.xlu1 %1538, %v1765_v33   ;;  %1135 = vperm.xlu0 %1539, %v1794_v38  }
 0x14a   :  { %v2254_v32 = vpop.permute.xlu1 %751  ;;  %v2256_v29 = vpop.permute.xlu0 %755 }
 0x14b   :  { %4475 = vst [vmem:[#allocation107_spill] sm:$0xff] %v2254_v32  ;;  %4476 = vst [vmem:[#allocation108_spill] sm:$0xff] %v2256_v29  ;;  %v4535_v29 = vld [vmem:[#allocation24_spill] sm:$0xff] }
 0x14c   :  { %1131 = vperm.xlu1 %1538, %v1777_v35   ;;  %1143 = vperm.xlu0 %1539, %v1806_v40  }
 0x14e   :  { %v2260_v34 = vpop.permute.xlu1 %759  ;;  %v2262_v31 = vpop.permute.xlu0 %763 }
 0x14f   :  { %4477 = vst [vmem:[#allocation109_spill] sm:$0xff] %v2260_v34  ;;  %4478 = vst [vmem:[#allocation110_spill] sm:$0xff] %v2262_v31 }
 0x150   :  { %1139 = vperm.xlu1 %1538, %v1789_v37   ;;  %1151 = vperm.xlu0 %1539, %v1818_v42  }
 0x152   :  { %v2266_v36 = vpop.permute.xlu1 %767  ;;  %v2268_v33 = vpop.permute.xlu0 %771 }
 0x153   :  { %4479 = vst [vmem:[#allocation111_spill] sm:$0xff] %v2266_v36  ;;  %4480 = vst [vmem:[#allocation112_spill] sm:$0xff] %v2268_v33  ;;  %v4530_v36 = vld [vmem:[#allocation21_spill] sm:$0xff] }
 0x154   :  { %1147 = vperm.xlu1 %1538, %v1801_v39   ;;  %1159 = vperm.xlu0 %1539, %v1830_v44  }
 0x156   :  { %v2272_v38 = vpop.permute.xlu1 %775  ;;  %v2274_v35 = vpop.permute.xlu0 %779 }
 0x157   :  { %4481 = vst [vmem:[#allocation113_spill] sm:$0xff] %v2272_v38  ;;  %4482 = vst [vmem:[#allocation114_spill] sm:$0xff] %v2274_v35  ;;  %v4529_v38 = vld [vmem:[#allocation20_spill] sm:$0xff] }
 0x158   :  { %1155 = vperm.xlu1 %1538, %v1813_v41   ;;  %1167 = vperm.xlu0 %1539, %v1842_v46  }
 0x15a   :  { %v2278_v40 = vpop.permute.xlu1 %783  ;;  %v2280_v37 = vpop.permute.xlu0 %787 }
 0x15b   :  { %4483 = vst [vmem:[#allocation115_spill] sm:$0xff] %v2278_v40  ;;  %4484 = vst [vmem:[#allocation116_spill] sm:$0xff] %v2280_v37  ;;  %v4527_v37 = vld [vmem:[#allocation18_spill] sm:$0xff]  ;;  %v4528_v40 = vld [vmem:[#allocation19_spill] sm:$0xff] }
 0x15c   :  { %1163 = vperm.xlu1 %1538, %v1825_v43   ;;  %1175 = vperm.xlu0 %1539, %v1854_v48  }
 0x15e   :  { %v2284_v42 = vpop.permute.xlu1 %791  ;;  %v2286_v39 = vpop.permute.xlu0 %795 }
 0x15f   :  { %4485 = vst [vmem:[#allocation117_spill] sm:$0xff] %v2284_v42  ;;  %4486 = vst [vmem:[#allocation118_spill] sm:$0xff] %v2286_v39  ;;  %v4497_v39 = vld [vmem:[#allocation3_spill] sm:$0xff] }
 0x160   :  { %1171 = vperm.xlu1 %1538, %v1837_v45   ;;  %1183 = vperm.xlu0 %1539, %v1866_v50   ;;  %v244_v50 = vlaneseq }
 0x162   :  { %v2290_v44 = vpop.permute.xlu1 %799  ;;  %v2292_v41 = vpop.permute.xlu0 %803 }
 0x163   :  { %4487 = vst [vmem:[#allocation119_spill] sm:$0xff] %v2290_v44  ;;  %4488 = vst [vmem:[#allocation120_spill] sm:$0xff] %v2292_v41  ;;  %v4493_v44 = vld [vmem:[#allocation2_spill] sm:$0xff]  ;;  %v4494_v41 = vld [vmem:[#allocation5_spill] sm:$0xff] }
 0x164   :  { %1179 = vperm.xlu1 %1538, %v1849_v47   ;;  %1191 = vperm.xlu0 %1539, %v1878_v52  }
 0x166   :  { %v2296_v46 = vpop.permute.xlu1 %807  ;;  %v2298_v43 = vpop.permute.xlu0 %811 }
 0x167   :  { %4489 = vst [vmem:[#allocation121_spill] sm:$0xff] %v2296_v46  ;;  %4490 = vst [vmem:[#allocation122_spill] sm:$0xff] %v2298_v43  ;;  %v245_v46 = vshrl.u32 %v244_v50, 7  ;;  %v4498_v43 = vld [vmem:[#allocation7_spill] sm:$0xff] }
 0x168   :  { %1187 = vperm.xlu1 %1538, %v1861_v49   ;;  %1199 = vperm.xlu0 %1539, %v1890_v54  }
 0x16a   :  { %v2302_v48 = vpop.permute.xlu1 %815  ;;  %v2304_v45 = vpop.permute.xlu0 %819 }
 0x16b   :  { %4491 = vst [vmem:[#allocation123_spill] sm:$0xff] %v2302_v48  ;;  %4492 = vst [vmem:[#allocation124_spill] sm:$0xff] %v2304_v45  ;;  %v2318_v48 = vsub.s32 0, %v245_v46  ;;  %v2320_v45 = vsub.s32 1, %v245_v46  ;;  %v4507_v46 = vld [vmem:[#allocation6_spill] sm:$0xff] }
 0x16c   :  { %1195 = vperm.xlu1 %1538, %v4493_v44   ;;  %1207 = vperm.xlu0 %1539, %v4494_v41   ;;  %v4503_v44 = vld [vmem:[#allocation4_spill] sm:$0xff]  ;;  %v17_v41 = vld [vmem:[%s4172_s0] sm:$0x3] }
 0x16d   :  { %4501 = vst [vmem:[#allocation125_spill] sm:$0xff] %v2318_v48  ;;  %4502 = vst [vmem:[#allocation126_spill] sm:$0xff] %v2320_v45 }
 0x16e   :  { %v2308_v47 = vpop.permute.xlu1 %823  ;;  %v2310_v52 = vpop.permute.xlu0 %827 }
 0x16f   :  { %4495 = vst [vmem:[#allocation2_spill] sm:$0xff] %v2308_v47  ;;  %4496 = vst [vmem:[#allocation5_spill] sm:$0xff] %v2310_v52  ;;  %v4511_v47 = vld [vmem:[#allocation8_spill] sm:$0xff] }
 0x170   :  { %1203 = vperm.xlu1 %1538, %v4497_v39   ;;  %1215 = vperm.xlu0 %1539, %v4498_v43   ;;  %v2332_v43 = vrot.slane %v17_v41, %v2318_v48 }
 0x172   :  { %v2314_v49 = vpop.permute.xlu1 %831  ;;  %v2316_v54 = vpop.permute.xlu0 %835  ;;  %4506 = vst [vmem:[#allocation128_spill] sm:$0xff] %v2332_v43  ;;  %v2434_v35 = vmul.f32 %v2332_v43, %v4528_v40 }
 0x173   :  { %4499 = vst [vmem:[#allocation3_spill] sm:$0xff] %v2314_v49  ;;  %4500 = vst [vmem:[#allocation7_spill] sm:$0xff] %v2316_v54  ;;  %v2335_v54 = vrot.slane %v17_v41, %v2320_v45  ;;  %v18_v41 = vld [vmem:[%s4173_s1] sm:$0x3] }
 0x174   :  { %1211 = vperm.xlu1 %1538, %v4503_v44   ;;  %1223 = vperm.xlu0 %1539, %v4432_v53   ;;  %v728_v44 = vmul.f32 %v2232_v21, %v2332_v43  ;;  %vm1311_vm0 = vcmp.eq.s32.totalorder %v18_v41, 1  ;;  %vm1310_vm1 = vcmp.eq.s32.totalorder %v18_v41, 0 }
 0x175   :  { %v729_v53 = vmul.f32 %v2232_v21, %v2335_v54  ;;  %v733_v21 = vmul.f32 %v2238_v23, %v2335_v54  ;;  %v2446_v33 = vmul.f32 %v2335_v54, %v4529_v38  ;;  %v2482_v32 = vmul.f32 %v2335_v54, %v4535_v29 }
 0x176   :  { %v2327_v50 = vpop.permute.xlu1 %839  ;;  %v2329_v39 = vpop.permute.xlu0 %843  ;;  %v2506_v26 = vmul.f32 %v2335_v54, %v4538_v28  ;;  %v2514_v19 = vmul.f32 %v2335_v54, %v4539_v24  ;;  %v2522_v17 = vmul.f32 %v2335_v54, %v4540_v22  ;;  %v2550_v14 = vmul.f32 %v2335_v54, %v4545_v11 }
 0x177   :  { %4504 = vst [vmem:[#allocation4_spill] sm:$0xff] %v2327_v50  ;;  %4505 = vst [vmem:[#allocation127_spill] sm:$0xff] %v2329_v39  ;;  %v2574_v5 = vmul.f32 %v2335_v54, %v4548_v10  ;;  %v2582_v3 = vmul.f32 %v2335_v54, %v4549_v8  ;;  %v2590_v1 = vmul.f32 %v2335_v54, %v4550_v6 }
 0x178   :  { %1219 = vperm.xlu1 %1538, %v4507_v46   ;;  %1231 = vperm.xlu0 %1539, %v4436_v55   ;;  %v732_v55 = vmul.f32 %v2238_v23, %v2332_v43  ;;  %v2618_v61 = vmul.f32 %v2335_v54, %v4557_v62 }
 0x17a   :  { %v2343_v49 = vpop.permute.xlu1 %847  ;;  %v852_v50 = vpop.permute.xlu0 %851  ;;  %4559 = vst [vmem:[#allocation24_spill] sm:$0xff] %v2618_v61 }
 0x17b   :  { %4508 = vst [vmem:[#allocation6_spill] sm:$0xff] %v2343_v49  ;;  %v2345_v39 = vadd.f32 %v852_v50, %v728_v44  ;;  %v2347_v52 = vadd.f32 %v852_v50, %v729_v53 }
 0x17c   :  { %1227 = vperm.xlu1 %1538, %v4511_v47   ;;  %1239 = vperm.xlu0 %1539, %v1950_v0   ;;  %v4515_v47 = vmov 0  }
 0x17d   :  { %4509 = vst [vmem:[#allocation129_spill] sm:$0xff] %v2345_v39  ;;  %4510 = vst [vmem:[#allocation130_spill] sm:$0xff] %v2347_v52  ;;  %v2366_v52 = vsel %vm1311_vm0, 1, %v4515_v47  ;;  %v2371_v39 = vsel %vm1310_vm1, 1, %v4515_v47 }
 0x17e   :  { %v2358_v46 = vpop.permute.xlu1 %855  ;;  %v860_v44 = vpop.permute.xlu0 %859  ;;  %4516 = vst [vmem:[#allocation133_spill] sm:$0xff] %v2366_v52  ;;  %4518 = vst [vmem:[#allocation135_spill] sm:$0xff] %v2371_v39  ;;  %v2454_v39 = vmul.f32 %v2335_v54, %v4530_v36 }
 0x17f   :  { %4512 = vst [vmem:[#allocation8_spill] sm:$0xff] %v2358_v46  ;;  %v2360_v50 = vadd.f32 %v860_v44, %v732_v55  ;;  %v2362_v53 = vadd.f32 %v860_v44, %v733_v21  ;;  %v4520_v44 = vld [vmem:[#allocation13_spill] sm:$0xff]  ;;  %v4522_v55 = vld [vmem:[#allocation14_spill] sm:$0xff]  ;;  %v4523_v21 = vld [vmem:[#allocation15_spill] sm:$0xff] }
 0x180   :  { %1235 = vperm.xlu1 %1538, %v4437_v57   ;;  %v2386_v47 = vmul.f32 %v2332_v43, %v4520_v44  ;;  %v2400_v57 = vmul.f32 %v2335_v54, %v4522_v55  ;;  %v2404_v41 = vmul.f32 %v2332_v43, %v4523_v21  ;;  %v2408_v46 = vmul.f32 %v2335_v54, %v4523_v21 }
 0x181   :  { %4513 = vst [vmem:[#allocation131_spill] sm:$0xff] %v2360_v50  ;;  %4514 = vst [vmem:[#allocation132_spill] sm:$0xff] %v2362_v53  ;;  %v2390_v53 = vmul.f32 %v2335_v54, %v4520_v44  ;;  %v2396_v50 = vmul.f32 %v2332_v43, %v4522_v55  ;;  %v2426_v21 = vmul.f32 %v2332_v43, %v4527_v37 }
 0x183   :  { %v2368_v0 = vpop.permute.xlu1 %927  ;;  %v2373_v23 = vpop.permute.xlu0 %931 }
 0x184   :  { %4517 = vst [vmem:[#allocation134_spill] sm:$0xff] %v2368_v0  ;;  %4519 = vst [vmem:[#allocation136_spill] sm:$0xff] %v2373_v23  ;;  %1243 = vperm.xlu1 %1538, %v4440_v59   ;;  %v4525_v23 = vld [vmem:[#allocation16_spill] sm:$0xff]  ;;  %v4526_v0 = vld [vmem:[#allocation17_spill] sm:$0xff] }
 0x185   :  { %v256_v49 = vmul.f32 %v2332_v43, %v4525_v23  ;;  %v2418_v55 = vmul.f32 %v2332_v43, %v4526_v0  ;;  %v2422_v42 = vmul.f32 %v2335_v54, %v4526_v0  ;;  %v2442_v0 = vmul.f32 %v2332_v43, %v4529_v38  ;;  %v4533_v38 = vld [vmem:[#allocation23_spill] sm:$0xff] }
 0x186   :  { %v2468_v48 = vmul.f32 %v2332_v43, %v4533_v38  ;;  %v2472_v52 = vmul.f32 %v2335_v54, %v4533_v38  ;;  %v4537_v38 = vld [vmem:[#allocation26_spill] sm:$0xff] }
 0x187   :  { %v2392_v59 = vpop.permute.xlu1 %935  ;;  %v2410_v44 = vpop.permute.xlu0 %943  ;;  %v2494_v25 = vmul.f32 %v2332_v43, %v4537_v38 }
 0x188   :  { %4521 = vst [vmem:[#allocation13_spill] sm:$0xff] %v2392_v59  ;;  %4524 = vst [vmem:[#allocation14_spill] sm:$0xff] %v2410_v44  ;;  %v257_v59 = vmul.f32 %v2335_v54, %v4525_v23  ;;  %v2430_v44 = vmul.f32 %v2335_v54, %v4527_v37  ;;  %v2438_v23 = vmul.f32 %v2335_v54, %v4528_v40  ;;  %v4532_v40 = vld [vmem:[#allocation22_spill] sm:$0xff] }
 0x189   :  { %v2450_v37 = vmul.f32 %v2332_v43, %v4530_v36  ;;  %v2460_v34 = vmul.f32 %v2332_v43, %v4532_v40  ;;  %v2464_v45 = vmul.f32 %v2335_v54, %v4532_v40  ;;  %v4536_v40 = vld [vmem:[#allocation25_spill] sm:$0xff] }
 0x18a   :  { %v2486_v27 = vmul.f32 %v2332_v43, %v4536_v40  ;;  %v2490_v30 = vmul.f32 %v2335_v54, %v4536_v40  ;;  %v2510_v40 = vmul.f32 %v2332_v43, %v4539_v24  ;;  %v4543_v24 = vld [vmem:[#allocation31_spill] sm:$0xff] }
 0x18b   :  { %v2456_v31 = vpop.permute.xlu1 %939  ;;  %v2474_v36 = vpop.permute.xlu0 %951  ;;  %v2536_v13 = vmul.f32 %v2332_v43, %v4543_v24  ;;  %v2540_v16 = vmul.f32 %v2335_v54, %v4543_v24  ;;  %v4547_v24 = vld [vmem:[#allocation34_spill] sm:$0xff] }
 0x18c   :  { %4531 = vst [vmem:[#allocation15_spill] sm:$0xff] %v2456_v31  ;;  %4534 = vst [vmem:[#allocation16_spill] sm:$0xff] %v2474_v36  ;;  %v2478_v31 = vmul.f32 %v2332_v43, %v4535_v29  ;;  %v2498_v36 = vmul.f32 %v2335_v54, %v4537_v38  ;;  %v2502_v29 = vmul.f32 %v2332_v43, %v4538_v28  ;;  %v4542_v28 = vld [vmem:[#allocation30_spill] sm:$0xff] }
 0x18d   :  { %v2518_v38 = vmul.f32 %v2332_v43, %v4540_v22  ;;  %v2528_v15 = vmul.f32 %v2332_v43, %v4542_v28  ;;  %v2532_v18 = vmul.f32 %v2335_v54, %v4542_v28  ;;  %v4546_v28 = vld [vmem:[#allocation33_spill] sm:$0xff]  ;;  %v2562_v7 = vmul.f32 %v2332_v43, %v4547_v24 }
 0x18e   :  { %v2554_v9 = vmul.f32 %v2332_v43, %v4546_v28  ;;  %v2558_v12 = vmul.f32 %v2335_v54, %v4546_v28  ;;  %v2578_v28 = vmul.f32 %v2332_v43, %v4549_v8  ;;  %v4553_v8 = vld [vmem:[#allocation39_spill] sm:$0xff] }
 0x18f   :  { %v2524_v20 = vpop.permute.xlu1 %947  ;;  %v2542_v22 = vpop.permute.xlu0 %959  ;;  %v2604_v51 = vmul.f32 %v2332_v43, %v4553_v8  ;;  %v2608_v58 = vmul.f32 %v2335_v54, %v4553_v8  ;;  %v4563_v8 = vld [vmem:[#allocation42_spill] sm:$0xff] }
 0x190   :  { %4541 = vst [vmem:[#allocation17_spill] sm:$0xff] %v2524_v20  ;;  %4544 = vst [vmem:[#allocation18_spill] sm:$0xff] %v2542_v22  ;;  %v2546_v20 = vmul.f32 %v2332_v43, %v4545_v11  ;;  %v2566_v22 = vmul.f32 %v2335_v54, %v4547_v24  ;;  %v2570_v11 = vmul.f32 %v2332_v43, %v4548_v10  ;;  %v4552_v10 = vld [vmem:[#allocation38_spill] sm:$0xff] }
 0x191   :  { %v2586_v24 = vmul.f32 %v2332_v43, %v4550_v6  ;;  %v2596_v2 = vmul.f32 %v2332_v43, %v4552_v10  ;;  %v2600_v60 = vmul.f32 %v2335_v54, %v4552_v10  ;;  %4554 = vst [vmem:[#allocation20_spill] sm:$0xff] %v2604_v51  ;;  %4555 = vst [vmem:[#allocation21_spill] sm:$0xff] %v2608_v58  ;;  %v4560_v10 = vld [vmem:[#allocation41_spill] sm:$0xff] }
 0x192   :  { %v2622_v63 = vmul.f32 %v2332_v43, %v4560_v10  ;;  %v2626_v56 = vmul.f32 %v2335_v54, %v4560_v10  ;;  %v2630_v58 = vmul.f32 %v2332_v43, %v4563_v8 }
 0x193   :  { %v2592_v4 = vpop.permute.xlu1 %955  ;;  %v2610_v6 = vpop.permute.xlu0 %967 }
 0x194   :  { %4551 = vst [vmem:[#allocation19_spill] sm:$0xff] %v2592_v4  ;;  %4556 = vst [vmem:[#allocation22_spill] sm:$0xff] %v2610_v6  ;;  %v2614_v4 = vmul.f32 %v2332_v43, %v4557_v62  ;;  %v2634_v6 = vmul.f32 %v2335_v54, %v4563_v8 }
 0x195   :  { %4561 = vst [vmem:[#allocation25_spill] sm:$0xff] %v2622_v63  ;;  %4562 = vst [vmem:[#allocation26_spill] sm:$0xff] %v2626_v56  ;;  %v4567_v63 = vld [vmem:[#allocation45_spill] sm:$0xff]  ;;  %v4570_v56 = vld [vmem:[#allocation46_spill] sm:$0xff] }
 0x196   :  { %4558 = vst [vmem:[#allocation23_spill] sm:$0xff] %v2614_v4  ;;  %4564 = vst [vmem:[#allocation27_spill] sm:$0xff] %v2630_v58  ;;  %v4565_v4 = vld [vmem:[#allocation44_spill] sm:$0xff]  ;;  %v2645_v51 = vadd.f32 %v4567_v63, %v256_v49  ;;  %v2648_v10 = vadd.f32 %v4567_v63, %v257_v59  ;;  %v2652_v58 = vadd.f32 %v4570_v56, %v2396_v50 }
 0x197   :  { %v2638_v62 = vmul.f32 %v2332_v43, %v4565_v4  ;;  %v2642_v61 = vmul.f32 %v2335_v54, %v4565_v4  ;;  %v2656_v8 = vadd.f32 %v4570_v56, %v2400_v57  ;;  %v2658_v43 = vpop.permute.xlu1 %963  ;;  %v4577_v63 = vld [vmem:[#allocation48_spill] sm:$0xff]  ;;  %v2676_v56 = vpop.permute.xlu0 %975  ;;  %v4581_v57 = vld [vmem:[#allocation49_spill] sm:$0xff] }
 0x198   :  { %4568 = vst [vmem:[#allocation29_spill] sm:$0xff] %v2645_v51  ;;  %4569 = vst [vmem:[#allocation30_spill] sm:$0xff] %v2648_v10  ;;  %v2670_v59 = vadd.f32 %v4577_v63, %v2386_v47  ;;  %v2674_v50 = vadd.f32 %v4577_v63, %v2390_v53  ;;  %v4587_v53 = vld [vmem:[#allocation51_spill] sm:$0xff]  ;;  %v4706_v51 = vld [vmem:[#allocation100_spill] sm:$0xff] }
 0x199   :  { %4566 = vst [vmem:[#allocation28_spill] sm:$0xff] %v2638_v62  ;;  %4571 = vst [vmem:[#allocation31_spill] sm:$0xff] %v2652_v58  ;;  %v4574_v62 = vld [vmem:[#allocation47_spill] sm:$0xff]  ;;  %v2696_v63 = vadd.f32 %v4587_v53, %v2434_v35 }
 0x19a   :  { %4572 = vst [vmem:[#allocation32_spill] sm:$0xff] %v2656_v8  ;;  %4573 = vst [vmem:[#allocation33_spill] sm:$0xff] %v2658_v43  ;;  %v2662_v4 = vadd.f32 %v4574_v62, %v2404_v41  ;;  %v2666_v49 = vadd.f32 %v4574_v62, %v2408_v46  ;;  %v2680_v43 = vadd.f32 %v4581_v57, %v2418_v55  ;;  %v4584_v46 = vld [vmem:[#allocation50_spill] sm:$0xff] }
 0x19b   :  { %4578 = vst [vmem:[#allocation36_spill] sm:$0xff] %v2670_v59  ;;  %4579 = vst [vmem:[#allocation37_spill] sm:$0xff] %v2674_v50  ;;  %v2684_v41 = vadd.f32 %v4581_v57, %v2422_v42  ;;  %v2688_v62 = vadd.f32 %v4584_v46, %v2426_v21  ;;  %v2692_v47 = vadd.f32 %v4584_v46, %v2430_v44  ;;  %v4593_v57 = vld [vmem:[#allocation53_spill] sm:$0xff]  ;;  %v4596_v46 = vld [vmem:[#allocation54_spill] sm:$0xff] }
 0x19c   :  { %4575 = vst [vmem:[#allocation34_spill] sm:$0xff] %v2662_v4  ;;  %4576 = vst [vmem:[#allocation35_spill] sm:$0xff] %v2666_v49  ;;  %v2700_v55 = vadd.f32 %v4587_v53, %v2438_v23  ;;  %v2712_v44 = vadd.f32 %v4593_v57, %v2450_v37  ;;  %v2716_v35 = vadd.f32 %v4593_v57, %v2454_v39  ;;  %v2726_v53 = vpop.permute.xlu1 %971  ;;  %v4603_v39 = vld [vmem:[#allocation56_spill] sm:$0xff]  ;;  %v4703_v4 = vld [vmem:[#allocation98_spill] sm:$0xff] }
 0x19d   :  { %4580 = vst [vmem:[#allocation38_spill] sm:$0xff] %v2676_v56  ;;  %4582 = vst [vmem:[#allocation39_spill] sm:$0xff] %v2680_v43  ;;  %v4590_v56 = vld [vmem:[#allocation52_spill] sm:$0xff]  ;;  %v2720_v23 = vadd.f32 %v4596_v46, %v2460_v34  ;;  %v2738_v57 = vadd.f32 %v4603_v39, %v2478_v31  ;;  %v2742_v34 = vadd.f32 %v4603_v39, %v2482_v32  ;;  %v4613_v32 = vld [vmem:[#allocation59_spill] sm:$0xff] }
 0x19e   :  { %4583 = vst [vmem:[#allocation40_spill] sm:$0xff] %v2684_v41  ;;  %4585 = vst [vmem:[#allocation41_spill] sm:$0xff] %v2688_v62  ;;  %v2704_v42 = vadd.f32 %v4590_v56, %v2442_v0  ;;  %v2708_v21 = vadd.f32 %v4590_v56, %v2446_v33  ;;  %v2724_v0 = vadd.f32 %v4596_v46, %v2464_v45  ;;  %v4600_v33 = vld [vmem:[#allocation55_spill] sm:$0xff]  ;;  %v2744_v45 = vpop.permute.xlu0 %983  ;;  %v4607_v46 = vld [vmem:[#allocation57_spill] sm:$0xff] }
 0x19f   :  { %4586 = vst [vmem:[#allocation42_spill] sm:$0xff] %v2692_v47  ;;  %4588 = vst [vmem:[#allocation44_spill] sm:$0xff] %v2696_v63  ;;  %v2730_v56 = vadd.f32 %v4600_v33, %v2468_v48  ;;  %v2734_v37 = vadd.f32 %v4600_v33, %v2472_v52  ;;  %v2752_v48 = vadd.f32 %v4607_v46, %v2490_v30  ;;  %v4610_v52 = vld [vmem:[#allocation58_spill] sm:$0xff]  ;;  %v4704_v62 = vld [vmem:[#allocation99_spill] sm:$0xff] }
 0x1a0   :  { %4589 = vst [vmem:[#allocation45_spill] sm:$0xff] %v2700_v55  ;;  %4591 = vst [vmem:[#allocation46_spill] sm:$0xff] %v2704_v42  ;;  %v2756_v33 = vadd.f32 %v4610_v52, %v2494_v25  ;;  %v2760_v31 = vadd.f32 %v4610_v52, %v2498_v36  ;;  %v2764_v39 = vadd.f32 %v4613_v32, %v2502_v29  ;;  %v4622_v52 = vld [vmem:[#allocation62_spill] sm:$0xff] }
 0x1a1   :  { %4592 = vst [vmem:[#allocation47_spill] sm:$0xff] %v2708_v21  ;;  %4594 = vst [vmem:[#allocation48_spill] sm:$0xff] %v2712_v44  ;;  %v4694_v44 = vld [vmem:[#allocation91_spill] sm:$0xff]  ;;  %v3116_v47 = vmul.f32 %v4703_v4, %v2335_v54  ;;  %v3124_v10 = vmul.f32 %v4704_v62, %v2335_v54  ;;  %v3132_v50 = vmul.f32 %v4706_v51, %v2335_v54 }
 0x1a2   :  { %4595 = vst [vmem:[#allocation49_spill] sm:$0xff] %v2716_v35  ;;  %4597 = vst [vmem:[#allocation50_spill] sm:$0xff] %v2720_v23  ;;  %v2748_v35 = vadd.f32 %v4607_v46, %v2486_v27  ;;  %v2768_v27 = vadd.f32 %v4613_v32, %v2506_v26  ;;  %v4619_v46 = vld [vmem:[#allocation61_spill] sm:$0xff]  ;;  %v2788_v26 = vadd.f32 %v4622_v52, %v2528_v15  ;;  %v2794_v32 = vpop.permute.xlu1 %979 }
 0x1a3   :  { %4598 = vst [vmem:[#allocation51_spill] sm:$0xff] %v2724_v0  ;;  %4599 = vst [vmem:[#allocation52_spill] sm:$0xff] %v2726_v53  ;;  %v2780_v36 = vadd.f32 %v4619_v46, %v2518_v38  ;;  %v2784_v29 = vadd.f32 %v4619_v46, %v2522_v17  ;;  %v4629_v17 = vld [vmem:[#allocation64_spill] sm:$0xff] }
 0x1a4   :  { %4601 = vst [vmem:[#allocation53_spill] sm:$0xff] %v2730_v56  ;;  %4602 = vst [vmem:[#allocation54_spill] sm:$0xff] %v2734_v37  ;;  %v2806_v46 = vadd.f32 %v4629_v17, %v2546_v20  ;;  %v2810_v15 = vadd.f32 %v4629_v17, %v2550_v14  ;;  %v4639_v14 = vld [vmem:[#allocation67_spill] sm:$0xff]  ;;  %v4695_v53 = vld [vmem:[#allocation92_spill] sm:$0xff] }
 0x1a5   :  { %4604 = vst [vmem:[#allocation55_spill] sm:$0xff] %v2738_v57  ;;  %4605 = vst [vmem:[#allocation56_spill] sm:$0xff] %v2742_v34  ;;  %v2832_v17 = vadd.f32 %v4639_v14, %v2570_v11  ;;  %v3064_v34 = vmul.f32 %v4695_v53, %v2335_v54 }
 0x1a6   :  { %4606 = vst [vmem:[#allocation137_spill] sm:$0xff] %v2744_v45  ;;  %4608 = vst [vmem:[#allocation57_spill] sm:$0xff] %v2748_v35  ;;  %v4616_v35 = vld [vmem:[#allocation60_spill] sm:$0xff]  ;;  %v3056_v45 = vmul.f32 %v4694_v44, %v2335_v54 }
 0x1a7   :  { %4609 = vst [vmem:[#allocation138_spill] sm:$0xff] %v2752_v48  ;;  %4611 = vst [vmem:[#allocation58_spill] sm:$0xff] %v2756_v33  ;;  %v2772_v30 = vadd.f32 %v4616_v35, %v2510_v40  ;;  %v2776_v25 = vadd.f32 %v4616_v35, %v2514_v19  ;;  %v2792_v40 = vadd.f32 %v4622_v52, %v2532_v18  ;;  %v4626_v19 = vld [vmem:[#allocation63_spill] sm:$0xff]  ;;  %v2812_v18 = vpop.permute.xlu0 %991  ;;  %v4633_v52 = vld [vmem:[#allocation65_spill] sm:$0xff] }
 0x1a8   :  { %4612 = vst [vmem:[#allocation139_spill] sm:$0xff] %v2760_v31  ;;  %4614 = vst [vmem:[#allocation59_spill] sm:$0xff] %v2764_v39  ;;  %v2798_v35 = vadd.f32 %v4626_v19, %v2536_v13  ;;  %v2802_v38 = vadd.f32 %v4626_v19, %v2540_v16  ;;  %v2820_v13 = vadd.f32 %v4633_v52, %v2558_v12  ;;  %v4636_v16 = vld [vmem:[#allocation66_spill] sm:$0xff]  ;;  %v4684_v39 = vld [vmem:[#allocation83_spill] sm:$0xff] }
 0x1a9   :  { %4615 = vst [vmem:[#allocation140_spill] sm:$0xff] %v2768_v27  ;;  %4617 = vst [vmem:[#allocation60_spill] sm:$0xff] %v2772_v30  ;;  %v2824_v19 = vadd.f32 %v4636_v16, %v2562_v7  ;;  %v2828_v20 = vadd.f32 %v4636_v16, %v2566_v22  ;;  %v4648_v16 = vld [vmem:[#allocation70_spill] sm:$0xff] }
 0x1aa   :  { %4618 = vst [vmem:[#allocation141_spill] sm:$0xff] %v2776_v25  ;;  %4620 = vst [vmem:[#allocation61_spill] sm:$0xff] %v2780_v36  ;;  %v4693_v31 = vld [vmem:[#allocation90_spill] sm:$0xff] }
 0x1ab   :  { %4621 = vst [vmem:[#allocation142_spill] sm:$0xff] %v2784_v29  ;;  %4623 = vst [vmem:[#allocation62_spill] sm:$0xff] %v2788_v26  ;;  %v2816_v29 = vadd.f32 %v4633_v52, %v2554_v9  ;;  %v2836_v9 = vadd.f32 %v4639_v14, %v2574_v5  ;;  %v4645_v52 = vld [vmem:[#allocation69_spill] sm:$0xff]  ;;  %v2856_v5 = vadd.f32 %v4648_v16, %v2596_v2  ;;  %v2862_v14 = vpop.permute.xlu1 %987  ;;  %v4660_v2 = vld [vmem:[#allocation24_spill] sm:$0xff] }
 0x1ac   :  { %4624 = vst [vmem:[#allocation143_spill] sm:$0xff] %v2792_v40  ;;  %4625 = vst [vmem:[#allocation144_spill] sm:$0xff] %v2794_v32  ;;  %v2848_v22 = vadd.f32 %v4645_v52, %v2586_v24  ;;  %v2852_v11 = vadd.f32 %v4645_v52, %v2590_v1  ;;  %v4655_v24 = vld [vmem:[#allocation21_spill] sm:$0xff]  ;;  %v4657_v1 = vld [vmem:[#allocation23_spill] sm:$0xff]  ;;  %v3048_v33 = vmul.f32 %v4693_v31, %v2335_v54 }
 0x1ad   :  { %4627 = vst [vmem:[#allocation63_spill] sm:$0xff] %v2798_v35  ;;  %4628 = vst [vmem:[#allocation145_spill] sm:$0xff] %v2802_v38  ;;  %v4658_v52 = vld [vmem:[#allocation72_spill] sm:$0xff] }
 0x1ae   :  { %4630 = vst [vmem:[#allocation64_spill] sm:$0xff] %v2806_v46  ;;  %4631 = vst [vmem:[#allocation146_spill] sm:$0xff] %v2810_v15  ;;  %v4683_v46 = vld [vmem:[#allocation82_spill] sm:$0xff] }
 0x1af   :  { %4632 = vst [vmem:[#allocation147_spill] sm:$0xff] %v2812_v18  ;;  %4634 = vst [vmem:[#allocation65_spill] sm:$0xff] %v2816_v29  ;;  %v4642_v29 = vld [vmem:[#allocation68_spill] sm:$0xff]  ;;  %v2980_v27 = vmul.f32 %v4683_v46, %v2335_v54 }
 0x1b0   :  { %4635 = vst [vmem:[#allocation148_spill] sm:$0xff] %v2820_v13  ;;  %4637 = vst [vmem:[#allocation66_spill] sm:$0xff] %v2824_v19  ;;  %v2840_v12 = vadd.f32 %v4642_v29, %v2578_v28  ;;  %v2844_v7 = vadd.f32 %v4642_v29, %v2582_v3  ;;  %v2860_v28 = vadd.f32 %v4648_v16, %v2600_v60  ;;  %v4652_v3 = vld [vmem:[#allocation20_spill] sm:$0xff]  ;;  %v4653_v29 = vld [vmem:[#allocation71_spill] sm:$0xff]  ;;  %v2880_v60 = vpop.permute.xlu0 %999 }
 0x1b1   :  { %4638 = vst [vmem:[#allocation149_spill] sm:$0xff] %v2828_v20  ;;  %4640 = vst [vmem:[#allocation67_spill] sm:$0xff] %v2832_v17  ;;  %v2878_v17 = vadd.f32 %v4658_v52, %v4660_v2  ;;  %v4663_v16 = vld [vmem:[#allocation27_spill] sm:$0xff]  ;;  %v4672_v2 = vld [vmem:[#allocation12_spill] sm:$0xff] }
 0x1b2   :  { %4641 = vst [vmem:[#allocation150_spill] sm:$0xff] %v2836_v9  ;;  %4643 = vst [vmem:[#allocation68_spill] sm:$0xff] %v2840_v12  ;;  %v2866_v9 = vadd.f32 %v4653_v29, %v4652_v3  ;;  %v4680_v12 = vld [vmem:[#allocation79_spill] sm:$0xff] }
 0x1b3   :  { %4644 = vst [vmem:[#allocation151_spill] sm:$0xff] %v2844_v7  ;;  %4646 = vst [vmem:[#allocation69_spill] sm:$0xff] %v2848_v22  ;;  %v2870_v22 = vadd.f32 %v4653_v29, %v4655_v24  ;;  %v4667_v29 = vld [vmem:[#allocation28_spill] sm:$0xff]  ;;  %v4668_v24 = vld [vmem:[#allocation10_spill] sm:$0xff]  ;;  %v2956_v35 = vmul.f32 %v4680_v12, %v2335_v54 }
 0x1b4   :  { %4647 = vst [vmem:[#allocation152_spill] sm:$0xff] %v2852_v11  ;;  %4649 = vst [vmem:[#allocation70_spill] sm:$0xff] %v2856_v5  ;;  %v2874_v11 = vadd.f32 %v4658_v52, %v4657_v1  ;;  %v2896_v1 = vadd.f32 %v4668_v24, %v2642_v61  ;;  %v4671_v52 = vld [vmem:[#allocation128_spill] sm:$0xff] }
 0x1b5   :  { %4650 = vst [vmem:[#allocation153_spill] sm:$0xff] %v2860_v28  ;;  %4651 = vst [vmem:[#allocation154_spill] sm:$0xff] %v2862_v14  ;;  %v4664_v28 = vld [vmem:[#allocation73_spill] sm:$0xff]  ;;  %v2952_v38 = vmul.f32 %v4680_v12, %v4671_v52  ;;  %v2976_v12 = vmul.f32 %v4683_v46, %v4671_v52 }
 0x1b6   :  { %4654 = vst [vmem:[#allocation20_spill] sm:$0xff] %v2866_v9  ;;  %4656 = vst [vmem:[#allocation71_spill] sm:$0xff] %v2870_v22  ;;  %v2884_v5 = vadd.f32 %v4664_v28, %v4663_v16  ;;  %v2888_v3 = vadd.f32 %v4664_v28, %v2634_v6  ;;  %v2892_v22 = vadd.f32 %v4668_v24, %v4667_v29  ;;  %v4674_v29 = vld [vmem:[#allocation75_spill] sm:$0xff]  ;;  %v4687_v46 = vld [vmem:[#allocation85_spill] sm:$0xff] }
 0x1b7   :  { %4659 = vst [vmem:[#allocation21_spill] sm:$0xff] %v2874_v11  ;;  %4661 = vst [vmem:[#allocation23_spill] sm:$0xff] %v2878_v17  ;;  %v2900_v9 = vmul.f32 %v4672_v2, %v4671_v52  ;;  %v2904_v16 = vmul.f32 %v4672_v2, %v2335_v54  ;;  %v2916_v61 = vmul.f32 %v4674_v29, %v4671_v52 }
 0x1b8   :  { %4662 = vst [vmem:[#allocation72_spill] sm:$0xff] %v2880_v60  ;;  %4665 = vst [vmem:[#allocation24_spill] sm:$0xff] %v2884_v5  ;;  %v4673_v5 = vld [vmem:[#allocation74_spill] sm:$0xff]  ;;  %v2920_v24 = vmul.f32 %v4674_v29, %v2335_v54  ;;  %v3002_v48 = vmul.f32 %v4687_v46, %v4671_v52  ;;  %v3006_v60 = vmul.f32 %v4687_v46, %v2335_v54  ;;  %v4691_v46 = vld [vmem:[#allocation88_spill] sm:$0xff] }
 0x1b9   :  { %4666 = vst [vmem:[#allocation27_spill] sm:$0xff] %v2888_v3  ;;  %4669 = vst [vmem:[#allocation73_spill] sm:$0xff] %v2892_v22  ;;  %v2908_v6 = vmul.f32 %v4673_v5, %v4671_v52  ;;  %v2912_v28 = vmul.f32 %v4673_v5, %v2335_v54  ;;  %v2930_v3 = vpop.permute.xlu1 %995  ;;  %v4677_v5 = vld [vmem:[#allocation77_spill] sm:$0xff]  ;;  %v4678_v29 = vld [vmem:[#allocation78_spill] sm:$0xff]  ;;  %v3028_v56 = vmul.f32 %v4691_v46, %v4671_v52 }
 0x1ba   :  { %4670 = vst [vmem:[#allocation28_spill] sm:$0xff] %v2896_v1  ;;  %v4675_v1 = vld [vmem:[#allocation76_spill] sm:$0xff]  ;;  %4676 = vst [vmem:[#allocation10_spill] sm:$0xff] %v2930_v3  ;;  %v2934_v17 = vmul.f32 %v4677_v5, %v4671_v52  ;;  %v2938_v11 = vmul.f32 %v4677_v5, %v2335_v54  ;;  %v2942_v13 = vmul.f32 %v4678_v29, %v4671_v52 }
 0x1bb   :  { %v2924_v2 = vmul.f32 %v4675_v1, %v4671_v52  ;;  %v2928_v22 = vmul.f32 %v4675_v1, %v2335_v54  ;;  %v2946_v7 = vmul.f32 %v4678_v29, %v2335_v54  ;;  %v2948_v1 = vpop.permute.xlu0 %1007  ;;  %v4681_v5 = vld [vmem:[#allocation80_spill] sm:$0xff]  ;;  %v4682_v29 = vld [vmem:[#allocation81_spill] sm:$0xff]  ;;  %v3032_v18 = vmul.f32 %v4691_v46, %v2335_v54  ;;  %4705 = vst [vmem:[#allocation77_spill] sm:$0xff] %v3124_v10 }
 0x1bc   :  { %4679 = vst [vmem:[#allocation128_spill] sm:$0xff] %v2948_v1  ;;  %v2960_v20 = vmul.f32 %v4681_v5, %v4671_v52  ;;  %v2964_v19 = vmul.f32 %v4681_v5, %v2335_v54  ;;  %v2968_v36 = vmul.f32 %v4682_v29, %v4671_v52  ;;  %v2972_v15 = vmul.f32 %v4682_v29, %v2335_v54  ;;  %v4685_v3 = vld [vmem:[#allocation84_spill] sm:$0xff] }
 0x1bd   :  { %v2984_v5 = vmul.f32 %v4684_v39, %v4671_v52  ;;  %v2988_v1 = vmul.f32 %v4684_v39, %v2335_v54  ;;  %v2992_v29 = vmul.f32 %v4685_v3, %v4671_v52  ;;  %v2996_v40 = vmul.f32 %v4685_v3, %v2335_v54  ;;  %v2998_v26 = vpop.permute.xlu1 %1003  ;;  %v4688_v39 = vld [vmem:[#allocation86_spill] sm:$0xff]  ;;  %4708 = vst [vmem:[#allocation79_spill] sm:$0xff] %v3132_v50 }
 0x1be   :  { %4686 = vst [vmem:[#allocation12_spill] sm:$0xff] %v2998_v26  ;;  %v3010_v14 = vmul.f32 %v4688_v39, %v4671_v52  ;;  %v3014_v25 = vmul.f32 %v4688_v39, %v2335_v54  ;;  %v4690_v26 = vld [vmem:[#allocation87_spill] sm:$0xff]  ;;  %v4692_v39 = vld [vmem:[#allocation89_spill] sm:$0xff]  ;;  %v3052_v46 = vmul.f32 %v4694_v44, %v4671_v52  ;;  %v4698_v44 = vld [vmem:[#allocation94_spill] sm:$0xff] }
 0x1bf   :  { %v3016_v3 = vpop.permute.xlu0 %1015  ;;  %v3020_v30 = vmul.f32 %v4690_v26, %v4671_v52  ;;  %v3024_v37 = vmul.f32 %v4690_v26, %v2335_v54  ;;  %v3036_v32 = vmul.f32 %v4692_v39, %v4671_v52  ;;  %v3044_v26 = vmul.f32 %v4693_v31, %v4671_v52  ;;  %v4697_v31 = vld [vmem:[#allocation93_spill] sm:$0xff] }
 0x1c0   :  { %4689 = vst [vmem:[#allocation74_spill] sm:$0xff] %v3016_v3  ;;  %v3040_v3 = vmul.f32 %v4692_v39, %v2335_v54  ;;  %v3060_v39 = vmul.f32 %v4695_v53, %v4671_v52  ;;  %v3070_v55 = vmul.f32 %v4697_v31, %v4671_v52  ;;  %v3074_v63 = vmul.f32 %v4697_v31, %v2335_v54  ;;  %v4701_v31 = vld [vmem:[#allocation96_spill] sm:$0xff] }
 0x1c1   :  { %v3066_v57 = vpop.permute.xlu1 %1011  ;;  %v3078_v0 = vmul.f32 %v4698_v44, %v4671_v52  ;;  %v3082_v23 = vmul.f32 %v4698_v44, %v2335_v54  ;;  %v3096_v21 = vmul.f32 %v4701_v31, %v4671_v52  ;;  %v3100_v42 = vmul.f32 %v4701_v31, %v2335_v54  ;;  %v4702_v44 = vld [vmem:[#allocation97_spill] sm:$0xff] }
 0x1c2   :  { %4696 = vst [vmem:[#allocation75_spill] sm:$0xff] %v3066_v57  ;;  %v4700_v57 = vld [vmem:[#allocation95_spill] sm:$0xff]  ;;  %v3104_v49 = vmul.f32 %v4702_v44, %v4671_v52  ;;  %v3120_v31 = vmul.f32 %v4704_v62, %v4671_v52  ;;  %v4713_v62 = vld [vmem:[#allocation102_spill] sm:$0xff] }
 0x1c3   :  { %v3084_v53 = vpop.permute.xlu0 %1023  ;;  %v3088_v41 = vmul.f32 %v4700_v57, %v4671_v52  ;;  %v3092_v43 = vmul.f32 %v4700_v57, %v2335_v54  ;;  %v3112_v57 = vmul.f32 %v4703_v4, %v4671_v52  ;;  %v4710_v4 = vld [vmem:[#allocation101_spill] sm:$0xff]  ;;  %v3146_v10 = vmul.f32 %v4713_v62, %v4671_v52 }
 0x1c4   :  { %4699 = vst [vmem:[#allocation76_spill] sm:$0xff] %v3084_v53  ;;  %v3108_v53 = vmul.f32 %v4702_v44, %v2335_v54  ;;  %v3128_v44 = vmul.f32 %v4706_v51, %v4671_v52  ;;  %v3138_v8 = vmul.f32 %v4710_v4, %v4671_v52  ;;  %v3142_v58 = vmul.f32 %v4710_v4, %v2335_v54  ;;  %v4718_v4 = vld [vmem:[#allocation104_spill] sm:$0xff] }
 0x1c5   :  { %v3134_v59 = vpop.permute.xlu1 %1019  ;;  %4714 = vst [vmem:[#allocation83_spill] sm:$0xff] %v3146_v10  ;;  %v3168_v10 = vadd.f32 %v4718_v4, %v2904_v16 }
 0x1c6   :  { %4707 = vst [vmem:[#allocation78_spill] sm:$0xff] %v3128_v44  ;;  %4709 = vst [vmem:[#allocation80_spill] sm:$0xff] %v3134_v59  ;;  %v3150_v44 = vmul.f32 %v4713_v62, %v2335_v54  ;;  %v4717_v59 = vld [vmem:[#allocation103_spill] sm:$0xff]  ;;  %v4719_v62 = vld [vmem:[#allocation105_spill] sm:$0xff] }
 0x1c7   :  { %4711 = vst [vmem:[#allocation81_spill] sm:$0xff] %v3138_v8  ;;  %4712 = vst [vmem:[#allocation82_spill] sm:$0xff] %v3142_v58  ;;  %v3152_v51 = vpop.permute.xlu0 %1031  ;;  %v3156_v50 = vadd.f32 %v4717_v59, %v2908_v6  ;;  %v3160_v8 = vadd.f32 %v4717_v59, %v2912_v28  ;;  %v3164_v58 = vadd.f32 %v4718_v4, %v2900_v9  ;;  %v4723_v28 = vld [vmem:[#allocation107_spill] sm:$0xff]  ;;  %v4724_v4 = vld [vmem:[#allocation108_spill] sm:$0xff] }
 0x1c8   :  { %4715 = vst [vmem:[#allocation84_spill] sm:$0xff] %v3150_v44  ;;  %4716 = vst [vmem:[#allocation85_spill] sm:$0xff] %v3152_v51  ;;  %v3172_v44 = vadd.f32 %v4719_v62, %v2916_v61  ;;  %v3176_v6 = vadd.f32 %v4719_v62, %v2920_v24  ;;  %v4720_v51 = vld [vmem:[#allocation106_spill] sm:$0xff]  ;;  %v3188_v16 = vadd.f32 %v4723_v28, %v2934_v17 }
 0x1c9   :  { %v3180_v59 = vadd.f32 %v4720_v51, %v2924_v2  ;;  %v3184_v9 = vadd.f32 %v4720_v51, %v2928_v22  ;;  %v3192_v61 = vadd.f32 %v4723_v28, %v2938_v11  ;;  %v3196_v24 = vadd.f32 %v4724_v4, %v2942_v13  ;;  %v3202_v62 = vpop.permute.xlu1 %1027  ;;  %v4728_v22 = vld [vmem:[#allocation133_spill] sm:$0xff]  ;;  %v4733_v11 = vld [vmem:[#allocation126_spill] sm:$0xff] }
 0x1ca   :  { %v3200_v2 = vadd.f32 %v4724_v4, %v2946_v7  ;;  %4727 = vst [vmem:[#allocation90_spill] sm:$0xff] %v3202_v62  ;;  %v4729_v51 = vld [vmem:[#allocation125_spill] sm:$0xff]  ;;  %v4734_v28 = vrot.slane %v4728_v22, %v4733_v11 }
 0x1cb   :  { %4721 = vst [vmem:[#allocation86_spill] sm:$0xff] %v3180_v59  ;;  %4722 = vst [vmem:[#allocation87_spill] sm:$0xff] %v3184_v9  ;;  %v4730_v9 = vrot.slane %v4728_v22, %v4729_v51  ;;  %v4737_v13 = vld [vmem:[#allocation109_spill] sm:$0xff]  ;;  %v3234_v22 = vpop.permute.xlu0 %1039 }
 0x1cc   :  { %4725 = vst [vmem:[#allocation88_spill] sm:$0xff] %v3196_v24  ;;  %4726 = vst [vmem:[#allocation89_spill] sm:$0xff] %v3200_v2  ;;  %vm3214_vm3 = vcmp.eq.s32.totalorder %v4734_v28, 1  ;;  %v3220_v7 = vadd.f32 %v4737_v13, %v2952_v38  ;;  %v3224_v4 = vadd.f32 %v4737_v13, %v2956_v35  ;;  %v4740_v28 = vld [vmem:[#allocation135_spill] sm:$0xff] }
 0x1cd   :  { %vm3207_vm2 = vcmp.eq.s32.totalorder %v4730_v9, 1  ;;  %v4738_v9 = vld [vmem:[#allocation110_spill] sm:$0xff]  ;;  %4739 = vst [vmem:[#allocation91_spill] sm:$0xff] %v3234_v22  ;;  %v4741_v24 = vrot.slane %v4740_v28, %v4729_v51  ;;  %v4744_v35 = vrot.slane %v4740_v28, %v4733_v11  ;;  %v4749_v11 = vld [vmem:[#allocation113_spill] sm:$0xff] }
 0x1ce   :  { %v3228_v62 = vadd.f32 %v4738_v9, %v2960_v20  ;;  %v3232_v2 = vadd.f32 %v4738_v9, %v2964_v19  ;;  %v4747_v20 = vld [vmem:[#allocation111_spill] sm:$0xff]  ;;  %v3268_v28 = vadd.f32 %v4749_v11, %v2984_v5 }
 0x1cf   :  { %vm3239_vm4 = vcmp.eq.s32.totalorder %v4741_v24, 1  ;;  %vm3246_vm5 = vcmp.eq.s32.totalorder %v4744_v35, 1  ;;  %v3252_v19 = vadd.f32 %v4747_v20, %v2968_v36  ;;  %v3256_v9 = vadd.f32 %v4747_v20, %v2972_v15  ;;  %v4748_v24 = vld [vmem:[#allocation112_spill] sm:$0xff]  ;;  %v4750_v35 = vld [vmem:[#allocation114_spill] sm:$0xff] }
 0x1d0   :  { %v3260_v51 = vadd.f32 %v4748_v24, %v2976_v12  ;;  %v3264_v22 = vadd.f32 %v4748_v24, %v2980_v27  ;;  %v3272_v36 = vadd.f32 %v4749_v11, %v2988_v1  ;;  %v3276_v15 = vadd.f32 %v4750_v35, %v2992_v29  ;;  %v4751_v27 = vld [vmem:[#allocation115_spill] sm:$0xff]  ;;  %v4752_v1 = vld [vmem:[#allocation116_spill] sm:$0xff]  ;;  %v3298_v11 = vpop.permute.xlu1 %1035 }
 0x1d1   :  { %v3280_v12 = vadd.f32 %v4750_v35, %v2996_v40  ;;  %v3284_v20 = vadd.f32 %v4751_v27, %v3002_v48  ;;  %v3288_v5 = vadd.f32 %v4751_v27, %v3006_v60  ;;  %v3292_v24 = vadd.f32 %v4752_v1, %v3010_v14  ;;  %4753 = vst [vmem:[#allocation92_spill] sm:$0xff] %v3298_v11  ;;  %v4754_v40 = vld [vmem:[#allocation117_spill] sm:$0xff]  ;;  %v4755_v60 = vld [vmem:[#allocation118_spill] sm:$0xff] }
 0x1d2   :  { %v3296_v29 = vadd.f32 %v4752_v1, %v3014_v25  ;;  %v3302_v35 = vadd.f32 %v4754_v40, %v3020_v30  ;;  %v3306_v48 = vadd.f32 %v4754_v40, %v3024_v37  ;;  %v3310_v27 = vadd.f32 %v4755_v60, %v3028_v56  ;;  %v3316_v25 = vpop.permute.xlu0 %1047  ;;  %v4757_v1 = vld [vmem:[#allocation119_spill] sm:$0xff]  ;;  %v4758_v37 = vld [vmem:[#allocation120_spill] sm:$0xff] }
 0x1d3   :  { %v3314_v14 = vadd.f32 %v4755_v60, %v3032_v18  ;;  %4756 = vst [vmem:[#allocation93_spill] sm:$0xff] %v3316_v25  ;;  %v3320_v11 = vadd.f32 %v4757_v1, %v3036_v32  ;;  %v3324_v30 = vadd.f32 %v4757_v1, %v3040_v3  ;;  %v3328_v40 = vadd.f32 %v4758_v37, %v3044_v26  ;;  %v4759_v18 = vld [vmem:[#allocation121_spill] sm:$0xff]  ;;  %v4760_v25 = vld [vmem:[#allocation122_spill] sm:$0xff]  ;;  %v4763_v1 = vld [vmem:[#allocation123_spill] sm:$0xff] }
 0x1d4   :  { %v3332_v56 = vadd.f32 %v4758_v37, %v3048_v33  ;;  %v3336_v60 = vadd.f32 %v4759_v18, %v3052_v46  ;;  %v3340_v32 = vadd.f32 %v4759_v18, %v3056_v45  ;;  %v3344_v3 = vadd.f32 %v4760_v25, %v3060_v39  ;;  %v4764_v37 = vld [vmem:[#allocation134_spill] sm:$0xff]  ;;  %v3362_v39 = vpop.permute.xlu1 %1043 }
 0x1d5   :  { %v3348_v26 = vadd.f32 %v4760_v25, %v3064_v34  ;;  %v3352_v33 = vadd.f32 %v4763_v1, %v3070_v55  ;;  %v3356_v46 = vadd.f32 %v4763_v1, %v3074_v63  ;;  %v1054_v45 = vmul.f32 %v4764_v37, %v4671_v52  ;;  %4765 = vst [vmem:[#allocation96_spill] sm:$0xff] %v3362_v39  ;;  %v4769_v25 = vld [vmem:[#allocation2_spill] sm:$0xff] }
 0x1d6   :  { %4761 = vst [vmem:[#allocation94_spill] sm:$0xff] %v3344_v3  ;;  %v1055_v18 = vmul.f32 %v4764_v37, %v2335_v54  ;;  %v4766_v3 = vld [vmem:[#allocation124_spill] sm:$0xff]  ;;  %v3374_v63 = vadd.f32 %v4769_v25, %v3088_v41  ;;  %v3378_v1 = vadd.f32 %v4769_v25, %v3092_v43  ;;  %v4770_v37 = vld [vmem:[#allocation5_spill] sm:$0xff]  ;;  %v4772_v43 = vld [vmem:[#allocation7_spill] sm:$0xff] }
 0x1d7   :  { %4762 = vst [vmem:[#allocation95_spill] sm:$0xff] %v3348_v26  ;;  %v3366_v34 = vadd.f32 %v4766_v3, %v3078_v0  ;;  %v3370_v55 = vadd.f32 %v4766_v3, %v3082_v23  ;;  %v1120_v26 = vpop.permute.xlu0 %1119  ;;  %v3382_v39 = vadd.f32 %v4770_v37, %v3096_v21  ;;  %v3386_v0 = vadd.f32 %v4770_v37, %v3100_v42  ;;  %v4771_v3 = vld [vmem:[#allocation3_spill] sm:$0xff]  ;;  %v4775_v42 = vld [vmem:[#allocation13_spill] sm:$0xff] }
 0x1d8   :  { %v1247_v23 = vadd.f32 %v1120_v26, %v1055_v18  ;;  %v3394_v41 = vadd.f32 %v4771_v3, %v3108_v53  ;;  %v3398_v25 = vadd.f32 %v4772_v43, %v3112_v57  ;;  %v3402_v21 = vadd.f32 %v4772_v43, %v3116_v47  ;;  %v3414_v57 = vpop.permute.xlu1 %1051  ;;  %v4777_v18 = vld [vmem:[#allocation4_spill] sm:$0xff]  ;;  %v4779_v37 = vld [vmem:[#allocation77_spill] sm:$0xff]  ;;  %v4781_v43 = vld [vmem:[#allocation31_spill] sm:$0xff] }
 0x1d9   :  { %4767 = vst [vmem:[#allocation97_spill] sm:$0xff] %v3366_v34  ;;  %4768 = vst [vmem:[#allocation98_spill] sm:$0xff] %v3370_v55  ;;  %v1246_v34 = vadd.f32 %v1120_v26, %v1054_v45  ;;  %v3390_v55 = vadd.f32 %v4771_v3, %v3104_v49  ;;  %v1058_v45 = vmul.f32 %v4775_v42, %v4671_v52 }
 0x1da   :  { %4773 = vst [vmem:[#allocation99_spill] sm:$0xff] %v3398_v25  ;;  %4774 = vst [vmem:[#allocation100_spill] sm:$0xff] %v3402_v21  ;;  %v1059_v26 = vmul.f32 %v4775_v42, %v2335_v54  ;;  %v1324_v53 = vsel %vm3214_vm3, %v3160_v8, %v1247_v23  ;;  %v3418_v47 = vadd.f32 %v4777_v18, %v3120_v31  ;;  %v4782_v21 = vld [vmem:[#allocation32_spill] sm:$0xff]  ;;  %v4783_v8 = vld [vmem:[#allocation78_spill] sm:$0xff] }
 0x1db   :  { %v1323_v49 = vsel %vm3207_vm2, %v3156_v50, %v1246_v34  ;;  %4776 = vst [vmem:[#allocation101_spill] sm:$0xff] %v3414_v57  ;;  %v3422_v3 = vadd.f32 %v4777_v18, %v4779_v37  ;;  %v1399_v50 = vsel %vm3246_vm5, %v4782_v21, %v1324_v53  ;;  %v1128_v34 = vpop.permute.xlu0 %1127  ;;  %v4784_v23 = vld [vmem:[#allocation127_spill] sm:$0xff]  ;;  %v4788_v53 = vld [vmem:[#allocation81_spill] sm:$0xff]  ;;  %v4789_v18 = vld [vmem:[#allocation6_spill] sm:$0xff] }
 0x1dc   :  { %4778 = vst [vmem:[#allocation102_spill] sm:$0xff] %v3418_v47  ;;  %v1398_v42 = vsel %vm3239_vm4, %v4781_v43, %v1323_v49  ;;  %v3432_v57 = vadd.f32 %v4784_v23, %v4783_v8  ;;  %v4786_v25 = vld [vmem:[#allocation79_spill] sm:$0xff]  ;;  %1464 = vst.msk [vmem:[%s4174_s4 + $0x8] sm:$0xff] %vm1463_vm6, %v1399_v50  ;;  %v1250_v49 = vadd.f32 %v1128_v34, %v1058_v45  ;;  %v4791_v43 = vld [vmem:[#allocation82_spill] sm:$0xff] }
 0x1dd   :  { %4780 = vst [vmem:[#allocation103_spill] sm:$0xff] %v3422_v3  ;;  %v3436_v31 = vadd.f32 %v4784_v23, %v4786_v25  ;;  %1462 = vst [vmem:[%s4174_s4] sm:$0xff] %v1398_v42  ;;  %v1251_v21 = vadd.f32 %v1128_v34, %v1059_v26  ;;  %v3447_v37 = vadd.f32 %v4789_v18, %v4788_v53  ;;  %v4793_v25 = vld [vmem:[#allocation136_spill] sm:$0xff]  ;;  %v1124_v34 = vpop.permute.xlu1 %1123  ;;  %v4797_v3 = vld [vmem:[#allocation15_spill] sm:$0xff] }
 0x1de   :  { %4785 = vst [vmem:[#allocation104_spill] sm:$0xff] %v3432_v57  ;;  %v3451_v8 = vadd.f32 %v4789_v18, %v4791_v43  ;;  %v1056_v23 = vmul.f32 %v4793_v25, %v4671_v52  ;;  %v1057_v42 = vmul.f32 %v4793_v25, %v2335_v54  ;;  %v1327_v26 = vsel %vm3207_vm2, %v3172_v44, %v1250_v49  ;;  %v4795_v53 = vld [vmem:[#allocation36_spill] sm:$0xff]  ;;  %v4796_v43 = vld [vmem:[#allocation37_spill] sm:$0xff] }
 0x1df   :  { %4787 = vst [vmem:[#allocation105_spill] sm:$0xff] %v3436_v31  ;;  %4790 = vst [vmem:[#allocation106_spill] sm:$0xff] %v3447_v37  ;;  %v4794_v31 = vld [vmem:[#allocation14_spill] sm:$0xff]  ;;  %v1328_v50 = vsel %vm3214_vm3, %v3176_v6, %v1251_v21  ;;  %v1402_v18 = vsel %vm3239_vm4, %v4795_v53, %v1327_v26  ;;  %v1060_v47 = vmul.f32 %v4797_v3, %v4671_v52  ;;  %v4798_v21 = vld [vmem:[#allocation16_spill] sm:$0xff] }
 0x1e0   :  { %4792 = vst [vmem:[#allocation107_spill] sm:$0xff] %v3451_v8  ;;  %v1062_v57 = vmul.f32 %v4794_v31, %v4671_v52  ;;  %v1063_v45 = vmul.f32 %v4794_v31, %v2335_v54  ;;  %v1403_v25 = vsel %vm3246_vm5, %v4796_v43, %v1328_v50  ;;  %v1248_v8 = vadd.f32 %v1124_v34, %v1056_v23  ;;  %v1136_v31 = vpop.permute.xlu0 %1135  ;;  %v4799_v50 = vld [vmem:[#allocation29_spill] sm:$0xff] }
 0x1e1   :  { %v1249_v37 = vadd.f32 %v1124_v34, %v1057_v42  ;;  %v1061_v44 = vmul.f32 %v4797_v3, %v2335_v54  ;;  %1467 = vst [vmem:[%s4174_s4 + $0x20] sm:$0xff] %v1402_v18  ;;  %1468 = vst.msk [vmem:[%s4174_s4 + $0x28] sm:$0xff] %vm1463_vm6, %v1403_v25  ;;  %v1066_v23 = vmul.f32 %v4798_v21, %v4671_v52  ;;  %v4802_v18 = vld [vmem:[#allocation42_spill] sm:$0xff] }
 0x1e2   :  { %v1254_v6 = vadd.f32 %v1136_v31, %v1062_v57  ;;  %v1255_v49 = vadd.f32 %v1136_v31, %v1063_v45  ;;  %v1067_v42 = vmul.f32 %v4798_v21, %v2335_v54  ;;  %v1325_v3 = vsel %vm3207_vm2, %v3164_v58, %v1248_v8  ;;  %v4800_v57 = vld [vmem:[#allocation30_spill] sm:$0xff]  ;;  %v1132_v8 = vpop.permute.xlu1 %1131  ;;  %v4803_v31 = vld [vmem:[#allocation17_spill] sm:$0xff] }
 0x1e3   :  { %v1326_v26 = vsel %vm3214_vm3, %v3168_v10, %v1249_v37  ;;  %v1400_v34 = vsel %vm3239_vm4, %v4799_v50, %v1325_v3  ;;  %v4801_v10 = vld [vmem:[#allocation41_spill] sm:$0xff]  ;;  %v1252_v43 = vadd.f32 %v1132_v8, %v1060_v47  ;;  %v4804_v47 = vld [vmem:[#allocation18_spill] sm:$0xff] }
 0x1e4   :  { %v1401_v45 = vsel %vm3246_vm5, %v4800_v57, %v1326_v26  ;;  %v1331_v53 = vsel %vm3207_vm2, %v3188_v16, %v1254_v6  ;;  %v1332_v58 = vsel %vm3214_vm3, %v3192_v61, %v1255_v49  ;;  %1465 = vst [vmem:[%s4174_s4 + $0x10] sm:$0xff] %v1400_v34  ;;  %v1253_v61 = vadd.f32 %v1132_v8, %v1061_v44  ;;  %v1144_v25 = vpop.permute.xlu0 %1143  ;;  %v4805_v50 = vld [vmem:[#allocation86_spill] sm:$0xff]  ;;  %v4806_v57 = vld [vmem:[#allocation87_spill] sm:$0xff] }
 0x1e5   :  { %1466 = vst.msk [vmem:[%s4174_s4 + $0x18] sm:$0xff] %vm1463_vm6, %v1401_v45  ;;  %v1406_v37 = vsel %vm3239_vm4, %v4801_v10, %v1331_v53  ;;  %v1407_v16 = vsel %vm3246_vm5, %v4802_v18, %v1332_v58  ;;  %v1064_v6 = vmul.f32 %v4803_v31, %v4671_v52  ;;  %v1065_v49 = vmul.f32 %v4803_v31, %v2335_v54  ;;  %v4807_v53 = vld [vmem:[#allocation34_spill] sm:$0xff]  ;;  %v4811_v31 = vld [vmem:[#allocation19_spill] sm:$0xff] }
 0x1e6   :  { %1471 = vst [vmem:[%s4174_s4 + $0x40] sm:$0xff] %v1406_v37  ;;  %1472 = vst.msk [vmem:[%s4174_s4 + $0x48] sm:$0xff] %vm1463_vm6, %v1407_v16  ;;  %v1258_v21 = vadd.f32 %v1144_v25, %v1066_v23  ;;  %v1259_v3 = vadd.f32 %v1144_v25, %v1067_v42  ;;  %v1070_v44 = vmul.f32 %v4804_v47, %v4671_v52  ;;  %v4808_v23 = vld [vmem:[#allocation35_spill] sm:$0xff]  ;;  %v1140_v37 = vpop.permute.xlu1 %1139  ;;  %v4809_v18 = vld [vmem:[#allocation46_spill] sm:$0xff] }
 0x1e7   :  { %v1071_v26 = vmul.f32 %v4804_v47, %v2335_v54  ;;  %v1329_v34 = vsel %vm3207_vm2, %v4805_v50, %v1252_v43  ;;  %v1330_v45 = vsel %vm3214_vm3, %v4806_v57, %v1253_v61  ;;  %v4810_v43 = vld [vmem:[#allocation47_spill] sm:$0xff]  ;;  %v1256_v61 = vadd.f32 %v1140_v37, %v1064_v6  ;;  %v4812_v6 = vld [vmem:[#allocation22_spill] sm:$0xff]  ;;  %v4813_v57 = vld [vmem:[#allocation88_spill] sm:$0xff] }
 0x1e8   :  { %v1404_v58 = vsel %vm3239_vm4, %v4807_v53, %v1329_v34  ;;  %v1405_v42 = vsel %vm3246_vm5, %v4808_v23, %v1330_v45  ;;  %v1335_v8 = vsel %vm3207_vm2, %v3220_v7, %v1258_v21  ;;  %v1336_v10 = vsel %vm3214_vm3, %v3224_v4, %v1259_v3  ;;  %v1152_v25 = vpop.permute.xlu0 %1151  ;;  %v4814_v53 = vld [vmem:[#allocation89_spill] sm:$0xff]  ;;  %v4815_v23 = vld [vmem:[#allocation39_spill] sm:$0xff] }
 0x1e9   :  { %1469 = vst [vmem:[%s4174_s4 + $0x30] sm:$0xff] %v1404_v58  ;;  %1470 = vst.msk [vmem:[%s4174_s4 + $0x38] sm:$0xff] %vm1463_vm6, %v1405_v42  ;;  %v1410_v16 = vsel %vm3239_vm4, %v4809_v18, %v1335_v8  ;;  %v1411_v7 = vsel %vm3246_vm5, %v4810_v43, %v1336_v10  ;;  %v1257_v4 = vadd.f32 %v1140_v37, %v1065_v49  ;;  %v4817_v18 = vld [vmem:[#allocation50_spill] sm:$0xff]  ;;  %v4818_v43 = vld [vmem:[#allocation51_spill] sm:$0xff] }
 0x1ea   :  { %v1068_v21 = vmul.f32 %v4811_v31, %v4671_v52  ;;  %v1069_v3 = vmul.f32 %v4811_v31, %v2335_v54  ;;  %1475 = vst [vmem:[%s4174_s4 + $0x60] sm:$0xff] %v1410_v16  ;;  %1476 = vst.msk [vmem:[%s4174_s4 + $0x68] sm:$0xff] %vm1463_vm6, %v1411_v7  ;;  %v1262_v47 = vadd.f32 %v1152_v25, %v1070_v44  ;;  %v4816_v44 = vld [vmem:[#allocation40_spill] sm:$0xff]  ;;  %v1148_v37 = vpop.permute.xlu1 %1147 }
 0x1eb   :  { %v1263_v50 = vadd.f32 %v1152_v25, %v1071_v26  ;;  %v1074_v49 = vmul.f32 %v4812_v6, %v4671_v52  ;;  %v1075_v34 = vmul.f32 %v4812_v6, %v2335_v54  ;;  %v1333_v45 = vsel %vm3207_vm2, %v4813_v57, %v1256_v61 }
 0x1ec   :  { %v1334_v58 = vsel %vm3214_vm3, %v4814_v53, %v1257_v4  ;;  %v1408_v42 = vsel %vm3239_vm4, %v4815_v23, %v1333_v45  ;;  %v1339_v8 = vsel %vm3207_vm2, %v3252_v19, %v1262_v47  ;;  %v1260_v7 = vadd.f32 %v1148_v37, %v1068_v21  ;;  %v1160_v61 = vpop.permute.xlu0 %1159  ;;  %v4819_v4 = vld [vmem:[#allocation33_spill] sm:$0xff]  ;;  %v4820_v21 = vld [vmem:[#allocation38_spill] sm:$0xff]  ;;  %v4821_v53 = vld [vmem:[#allocation44_spill] sm:$0xff] }
 0x1ed   :  { %v1409_v26 = vsel %vm3246_vm5, %v4816_v44, %v1334_v58  ;;  %v1340_v10 = vsel %vm3214_vm3, %v3256_v9, %v1263_v50  ;;  %1473 = vst [vmem:[%s4174_s4 + $0x50] sm:$0xff] %v1408_v42  ;;  %v1414_v16 = vsel %vm3239_vm4, %v4817_v18, %v1339_v8  ;;  %v1261_v9 = vadd.f32 %v1148_v37, %v1069_v3  ;;  %v4825_v37 = vld [vmem:[#allocation52_spill] sm:$0xff] }
 0x1ee   :  { %1474 = vst.msk [vmem:[%s4174_s4 + $0x58] sm:$0xff] %vm1463_vm6, %v1409_v26  ;;  %v1415_v19 = vsel %vm3246_vm5, %v4818_v43, %v1340_v10  ;;  %v1072_v25 = vmul.f32 %v4819_v4, %v4671_v52  ;;  %v1073_v31 = vmul.f32 %v4819_v4, %v2335_v54  ;;  %1479 = vst [vmem:[%s4174_s4 + $0x80] sm:$0xff] %v1414_v16  ;;  %v1156_v42 = vpop.permute.xlu1 %1155  ;;  %v4824_v26 = vld [vmem:[#allocation56_spill] sm:$0xff] }
 0x1ef   :  { %1480 = vst.msk [vmem:[%s4174_s4 + $0x88] sm:$0xff] %vm1463_vm6, %v1415_v19  ;;  %v1266_v47 = vadd.f32 %v1160_v61, %v1074_v49  ;;  %v1267_v50 = vadd.f32 %v1160_v61, %v1075_v34  ;;  %v1078_v3 = vmul.f32 %v4820_v21, %v4671_v52  ;;  %v1079_v6 = vmul.f32 %v4820_v21, %v2335_v54  ;;  %v4822_v49 = vld [vmem:[#allocation45_spill] sm:$0xff] }
 0x1f0   :  { %v1337_v57 = vsel %vm3207_vm2, %v3228_v62, %v1260_v7  ;;  %v1338_v45 = vsel %vm3214_vm3, %v3232_v2, %v1261_v9  ;;  %v4823_v2 = vld [vmem:[#allocation55_spill] sm:$0xff]  ;;  %v1264_v8 = vadd.f32 %v1156_v42, %v1072_v25  ;;  %v1168_v10 = vpop.permute.xlu0 %1167  ;;  %v1076_v18 = vmul.f32 %v4825_v37, %v4671_v52  ;;  %v4826_v7 = vld [vmem:[#allocation137_spill] sm:$0xff] }
 0x1f1   :  { %v1412_v58 = vsel %vm3239_vm4, %v4821_v53, %v1337_v57  ;;  %v1413_v34 = vsel %vm3246_vm5, %v4822_v49, %v1338_v45  ;;  %v1343_v23 = vsel %vm3207_vm2, %v3268_v28, %v1266_v47  ;;  %v1344_v62 = vsel %vm3214_vm3, %v3272_v36, %v1267_v50  ;;  %v4828_v50 = vld [vmem:[#allocation49_spill] sm:$0xff]  ;;  %v4830_v45 = vld [vmem:[#allocation139_spill] sm:$0xff]  ;;  %v4831_v49 = vld [vmem:[#allocation144_spill] sm:$0xff] }
 0x1f2   :  { %1477 = vst [vmem:[%s4174_s4 + $0x70] sm:$0xff] %v1412_v58  ;;  %1478 = vst.msk [vmem:[%s4174_s4 + $0x78] sm:$0xff] %vm1463_vm6, %v1413_v34  ;;  %v1418_v44 = vsel %vm3239_vm4, %v4823_v2, %v1343_v23  ;;  %v1419_v28 = vsel %vm3246_vm5, %v4824_v26, %v1344_v62  ;;  %v1265_v36 = vadd.f32 %v1156_v42, %v1073_v31  ;;  %v4827_v31 = vld [vmem:[#allocation48_spill] sm:$0xff]  ;;  %v4832_v2 = vld [vmem:[#allocation147_spill] sm:$0xff] }
 0x1f3   :  { %v1077_v16 = vmul.f32 %v4825_v37, %v2335_v54  ;;  %1483 = vst [vmem:[%s4174_s4 + $0xa0] sm:$0xff] %v1418_v44  ;;  %1484 = vst.msk [vmem:[%s4174_s4 + $0xa8] sm:$0xff] %vm1463_vm6, %v1419_v28  ;;  %v1270_v43 = vadd.f32 %v1168_v10, %v1078_v3  ;;  %v1271_v19 = vadd.f32 %v1168_v10, %v1079_v6  ;;  %v1164_v6 = vpop.permute.xlu1 %1163  ;;  %v4834_v37 = vld [vmem:[#allocation54_spill] sm:$0xff] }
 0x1f4   :  { %v1082_v9 = vmul.f32 %v4826_v7, %v4671_v52  ;;  %v1083_v61 = vmul.f32 %v4826_v7, %v2335_v54  ;;  %v1341_v4 = vsel %vm3207_vm2, %v3260_v51, %v1264_v8  ;;  %v1342_v25 = vsel %vm3214_vm3, %v3264_v22, %v1265_v36  ;;  %v4829_v22 = vld [vmem:[#allocation58_spill] sm:$0xff]  ;;  %v1176_v58 = vpop.permute.xlu0 %1175  ;;  %v4833_v36 = vld [vmem:[#allocation53_spill] sm:$0xff] }
 0x1f5   :  { %v1416_v47 = vsel %vm3239_vm4, %v4827_v31, %v1341_v4  ;;  %v1417_v21 = vsel %vm3246_vm5, %v4828_v50, %v1342_v25  ;;  %v1347_v3 = vsel %vm3207_vm2, %v3284_v20, %v1270_v43  ;;  %v1348_v51 = vsel %vm3214_vm3, %v3288_v5, %v1271_v19  ;;  %v4836_v7 = vld [vmem:[#allocation141_spill] sm:$0xff]  ;;  %v4837_v4 = vld [vmem:[#allocation154_spill] sm:$0xff] }
 0x1f6   :  { %1481 = vst [vmem:[%s4174_s4 + $0x90] sm:$0xff] %v1416_v47  ;;  %1482 = vst.msk [vmem:[%s4174_s4 + $0x98] sm:$0xff] %vm1463_vm6, %v1417_v21  ;;  %v1422_v57 = vsel %vm3239_vm4, %v4829_v22, %v1347_v3  ;;  %v1423_v20 = vsel %vm3246_vm5, %v4830_v45, %v1348_v51  ;;  %v1268_v53 = vadd.f32 %v1164_v6, %v1076_v18  ;;  %v4838_v21 = vld [vmem:[#allocation72_spill] sm:$0xff] }
 0x1f7   :  { %v1269_v5 = vadd.f32 %v1164_v6, %v1077_v16  ;;  %v1080_v34 = vmul.f32 %v4831_v49, %v4671_v52  ;;  %v1081_v23 = vmul.f32 %v4831_v49, %v2335_v54  ;;  %1487 = vst [vmem:[%s4174_s4 + $0xc0] sm:$0xff] %v1422_v57  ;;  %1488 = vst.msk [vmem:[%s4174_s4 + $0xc8] sm:$0xff] %vm1463_vm6, %v1423_v20  ;;  %v1172_v43 = vpop.permute.xlu1 %1171  ;;  %v4839_v57 = vld [vmem:[#allocation57_spill] sm:$0xff]  ;;  %v4840_v20 = vld [vmem:[#allocation138_spill] sm:$0xff] }
 0x1f8   :  { %v1274_v62 = vadd.f32 %v1176_v58, %v1082_v9  ;;  %v1275_v42 = vadd.f32 %v1176_v58, %v1083_v61  ;;  %v1086_v44 = vmul.f32 %v4832_v2, %v4671_v52  ;;  %v1087_v26 = vmul.f32 %v4832_v2, %v2335_v54  ;;  %v1184_v61 = vpop.permute.xlu0 %1183 }
 0x1f9   :  { %v1345_v28 = vsel %vm3207_vm2, %v3276_v15, %v1268_v53  ;;  %v1346_v8 = vsel %vm3214_vm3, %v3280_v12, %v1269_v5  ;;  %v4835_v12 = vld [vmem:[#allocation60_spill] sm:$0xff]  ;;  %v1272_v9 = vadd.f32 %v1172_v43, %v1080_v34  ;;  %v1084_v25 = vmul.f32 %v4837_v4, %v4671_v52  ;;  %v4842_v34 = vld [vmem:[#allocation143_spill] sm:$0xff] }
 0x1fa   :  { %v1420_v10 = vsel %vm3239_vm4, %v4833_v36, %v1345_v28  ;;  %v1421_v18 = vsel %vm3246_vm5, %v4834_v37, %v1346_v8  ;;  %v1351_v16 = vsel %vm3207_vm2, %v3302_v35, %v1274_v62  ;;  %v1352_v15 = vsel %vm3214_vm3, %v3306_v48, %v1275_v42  ;;  %v4843_v42 = vld [vmem:[#allocation10_spill] sm:$0xff]  ;;  %v4844_v8 = vld [vmem:[#allocation128_spill] sm:$0xff] }
 0x1fb   :  { %1485 = vst [vmem:[%s4174_s4 + $0xb0] sm:$0xff] %v1420_v10  ;;  %1486 = vst.msk [vmem:[%s4174_s4 + $0xb8] sm:$0xff] %vm1463_vm6, %v1421_v18  ;;  %v1426_v19 = vsel %vm3239_vm4, %v4835_v12, %v1351_v16  ;;  %v1427_v35 = vsel %vm3246_vm5, %v4836_v7, %v1352_v15  ;;  %v1273_v48 = vadd.f32 %v1172_v43, %v1081_v23  ;;  %v1180_v58 = vpop.permute.xlu1 %1179  ;;  %v4845_v16 = vld [vmem:[#allocation59_spill] sm:$0xff]  ;;  %v4846_v43 = vld [vmem:[#allocation140_spill] sm:$0xff] }
 0x1fc   :  { %v1085_v31 = vmul.f32 %v4837_v4, %v2335_v54  ;;  %1491 = vst [vmem:[%s4174_s4 + $0xe0] sm:$0xff] %v1426_v19  ;;  %1492 = vst.msk [vmem:[%s4174_s4 + $0xe8] sm:$0xff] %vm1463_vm6, %v1427_v35  ;;  %v1278_v47 = vadd.f32 %v1184_v61, %v1086_v44  ;;  %v1279_v50 = vadd.f32 %v1184_v61, %v1087_v26  ;;  %v1192_v62 = vpop.permute.xlu0 %1191  ;;  %v4849_v4 = vld [vmem:[#allocation12_spill] sm:$0xff] }
 0x1fd   :  { %v1090_v3 = vmul.f32 %v4838_v21, %v4671_v52  ;;  %v1091_v51 = vmul.f32 %v4838_v21, %v2335_v54  ;;  %v1349_v6 = vsel %vm3207_vm2, %v3292_v24, %v1272_v9  ;;  %v1350_v22 = vsel %vm3214_vm3, %v3296_v29, %v1273_v48  ;;  %v4841_v29 = vld [vmem:[#allocation62_spill] sm:$0xff] }
 0x1fe   :  { %v1424_v45 = vsel %vm3239_vm4, %v4839_v57, %v1349_v6  ;;  %v1425_v53 = vsel %vm3246_vm5, %v4840_v20, %v1350_v22  ;;  %v1355_v5 = vsel %vm3207_vm2, %v3320_v11, %v1278_v47  ;;  %v1356_v24 = vsel %vm3214_vm3, %v3324_v30, %v1279_v50  ;;  %v4848_v9 = vld [vmem:[#allocation146_spill] sm:$0xff]  ;;  %v4851_v57 = vld [vmem:[#allocation61_spill] sm:$0xff] }
 0x1ff   :  { %1489 = vst [vmem:[%s4174_s4 + $0xd0] sm:$0xff] %v1424_v45  ;;  %1490 = vst.msk [vmem:[%s4174_s4 + $0xd8] sm:$0xff] %vm1463_vm6, %v1425_v53  ;;  %v1430_v49 = vsel %vm3239_vm4, %v4841_v29, %v1355_v5  ;;  %v1431_v11 = vsel %vm3246_vm5, %v4842_v34, %v1356_v24  ;;  %v1276_v23 = vadd.f32 %v1180_v58, %v1084_v25  ;;  %v1188_v7 = vpop.permute.xlu1 %1187  ;;  %v4850_v21 = vld [vmem:[#allocation74_spill] sm:$0xff]  ;;  %v4854_v29 = vld [vmem:[#allocation149_spill] sm:$0xff] }
 0x200   :  { %v1277_v30 = vadd.f32 %v1180_v58, %v1085_v31  ;;  %v1088_v2 = vmul.f32 %v4843_v42, %v4671_v52  ;;  %v1089_v44 = vmul.f32 %v4843_v42, %v2335_v54  ;;  %1495 = vst [vmem:[%s4174_s4 + $0x100] sm:$0xff] %v1430_v49  ;;  %1496 = vst.msk [vmem:[%s4174_s4 + $0x108] sm:$0xff] %vm1463_vm6, %v1431_v11  ;;  %v1200_v61 = vpop.permute.xlu0 %1199  ;;  %v4852_v20 = vld [vmem:[#allocation142_spill] sm:$0xff]  ;;  %v4855_v11 = vld [vmem:[#allocation75_spill] sm:$0xff] }
 0x201   :  { %v1282_v26 = vadd.f32 %v1192_v62, %v1090_v3  ;;  %v1283_v28 = vadd.f32 %v1192_v62, %v1091_v51  ;;  %v1094_v36 = vmul.f32 %v4844_v8, %v4671_v52  ;;  %v1095_v10 = vmul.f32 %v4844_v8, %v2335_v54 }
 0x202   :  { %v1353_v37 = vsel %vm3207_vm2, %v3310_v27, %v1276_v23  ;;  %v1354_v18 = vsel %vm3214_vm3, %v3314_v14, %v1277_v30  ;;  %v4847_v14 = vld [vmem:[#allocation64_spill] sm:$0xff]  ;;  %v1280_v48 = vadd.f32 %v1188_v7, %v1088_v2  ;;  %v1092_v25 = vmul.f32 %v4849_v4, %v4671_v52 }
 0x203   :  { %v1428_v15 = vsel %vm3239_vm4, %v4845_v16, %v1353_v37  ;;  %v1429_v12 = vsel %vm3246_vm5, %v4846_v43, %v1354_v18  ;;  %v1359_v19 = vsel %vm3207_vm2, %v3336_v60, %v1282_v26  ;;  %v1360_v27 = vsel %vm3214_vm3, %v3340_v32, %v1283_v28  ;;  %v1196_v24 = vpop.permute.xlu1 %1195  ;;  %v4856_v2 = vld [vmem:[#allocation76_spill] sm:$0xff]  ;;  %v4857_v28 = vld [vmem:[#allocation94_spill] sm:$0xff]  ;;  %v4859_v37 = vld [vmem:[#allocation63_spill] sm:$0xff] }
 0x204   :  { %1493 = vst [vmem:[%s4174_s4 + $0xf0] sm:$0xff] %v1428_v15  ;;  %1494 = vst.msk [vmem:[%s4174_s4 + $0xf8] sm:$0xff] %vm1463_vm6, %v1429_v12  ;;  %v1434_v35 = vsel %vm3239_vm4, %v4847_v14, %v1359_v19  ;;  %v1435_v60 = vsel %vm3246_vm5, %v4848_v9, %v1360_v27  ;;  %v1281_v32 = vadd.f32 %v1188_v7, %v1089_v44  ;;  %v1208_v34 = vpop.permute.xlu0 %1207  ;;  %v4860_v16 = vld [vmem:[#allocation145_spill] sm:$0xff]  ;;  %v4861_v27 = vld [vmem:[#allocation68_spill] sm:$0xff] }
 0x205   :  { %v1093_v31 = vmul.f32 %v4849_v4, %v2335_v54  ;;  %1499 = vst [vmem:[%s4174_s4 + $0x120] sm:$0xff] %v1434_v35  ;;  %1500 = vst.msk [vmem:[%s4174_s4 + $0x128] sm:$0xff] %vm1463_vm6, %v1435_v60  ;;  %v1286_v47 = vadd.f32 %v1200_v61, %v1094_v36  ;;  %v1287_v50 = vadd.f32 %v1200_v61, %v1095_v10  ;;  %v4858_v36 = vld [vmem:[#allocation95_spill] sm:$0xff]  ;;  %v4863_v60 = vld [vmem:[#allocation80_spill] sm:$0xff] }
 0x206   :  { %v1098_v3 = vmul.f32 %v4850_v21, %v4671_v52  ;;  %v1099_v51 = vmul.f32 %v4850_v21, %v2335_v54  ;;  %v1357_v6 = vsel %vm3207_vm2, %v3328_v40, %v1280_v48  ;;  %v1358_v22 = vsel %vm3214_vm3, %v3332_v56, %v1281_v32  ;;  %v4853_v56 = vld [vmem:[#allocation66_spill] sm:$0xff]  ;;  %v4862_v14 = vld [vmem:[#allocation151_spill] sm:$0xff] }
 0x207   :  { %v1432_v45 = vsel %vm3239_vm4, %v4851_v57, %v1357_v6  ;;  %v1433_v53 = vsel %vm3246_vm5, %v4852_v20, %v1358_v22  ;;  %v1363_v5 = vsel %vm3207_vm2, %v3352_v33, %v1286_v47  ;;  %v1364_v40 = vsel %vm3214_vm3, %v3356_v46, %v1287_v50  ;;  %v1204_v19 = vpop.permute.xlu1 %1203  ;;  %v4865_v50 = vld [vmem:[#allocation97_spill] sm:$0xff]  ;;  %v4868_v57 = vld [vmem:[#allocation148_spill] sm:$0xff] }
 0x208   :  { %1497 = vst [vmem:[%s4174_s4 + $0x110] sm:$0xff] %v1432_v45  ;;  %1498 = vst.msk [vmem:[%s4174_s4 + $0x118] sm:$0xff] %vm1463_vm6, %v1433_v53  ;;  %v1438_v58 = vsel %vm3239_vm4, %v4853_v56, %v1363_v5  ;;  %v1439_v33 = vsel %vm3246_vm5, %v4854_v29, %v1364_v40  ;;  %v1284_v49 = vadd.f32 %v1196_v24, %v1092_v25  ;;  %v1216_v9 = vpop.permute.xlu0 %1215  ;;  %v4864_v25 = vld [vmem:[#allocation85_spill] sm:$0xff]  ;;  %v4869_v40 = vld [vmem:[#allocation70_spill] sm:$0xff] }
 0x209   :  { %v1285_v46 = vadd.f32 %v1196_v24, %v1093_v31  ;;  %v1096_v23 = vmul.f32 %v4855_v11, %v4671_v52  ;;  %v1097_v30 = vmul.f32 %v4855_v11, %v2335_v54  ;;  %1503 = vst [vmem:[%s4174_s4 + $0x140] sm:$0xff] %v1438_v58  ;;  %1504 = vst.msk [vmem:[%s4174_s4 + $0x148] sm:$0xff] %vm1463_vm6, %v1439_v33  ;;  %v4867_v6 = vld [vmem:[#allocation65_spill] sm:$0xff]  ;;  %v4871_v33 = vld [vmem:[#allocation90_spill] sm:$0xff] }
 0x20a   :  { %v1290_v62 = vadd.f32 %v1208_v34, %v1098_v3  ;;  %v1291_v42 = vadd.f32 %v1208_v34, %v1099_v51  ;;  %v1102_v44 = vmul.f32 %v4856_v2, %v4671_v52  ;;  %v1103_v26 = vmul.f32 %v4856_v2, %v2335_v54  ;;  %v4866_v3 = vld [vmem:[#allocation98_spill] sm:$0xff]  ;;  %v4870_v56 = vld [vmem:[#allocation153_spill] sm:$0xff] }
 0x20b   :  { %v1361_v8 = vsel %vm3207_vm2, %v4857_v28, %v1284_v49  ;;  %v1362_v10 = vsel %vm3214_vm3, %v4858_v36, %v1285_v46  ;;  %v1288_v35 = vadd.f32 %v1204_v19, %v1096_v23  ;;  %v1100_v48 = vmul.f32 %v4863_v60, %v4671_v52  ;;  %v1212_v5 = vpop.permute.xlu1 %1211  ;;  %v4872_v23 = vld [vmem:[#allocation91_spill] sm:$0xff]  ;;  %v4874_v28 = vld [vmem:[#allocation150_spill] sm:$0xff] }
 0x20c   :  { %v1436_v18 = vsel %vm3239_vm4, %v4859_v37, %v1361_v8  ;;  %v1437_v15 = vsel %vm3246_vm5, %v4860_v16, %v1362_v10  ;;  %v1367_v43 = vsel %vm3207_vm2, %v3374_v63, %v1290_v62  ;;  %v1368_v12 = vsel %vm3214_vm3, %v3378_v1, %v1291_v42  ;;  %v1224_v29 = vpop.permute.xlu0 %1223  ;;  %v4875_v36 = vld [vmem:[#allocation102_spill] sm:$0xff]  ;;  %v4876_v37 = vld [vmem:[#allocation103_spill] sm:$0xff] }
 0x20d   :  { %1501 = vst [vmem:[%s4174_s4 + $0x130] sm:$0xff] %v1436_v18  ;;  %1502 = vst.msk [vmem:[%s4174_s4 + $0x138] sm:$0xff] %vm1463_vm6, %v1437_v15  ;;  %v1442_v7 = vsel %vm3239_vm4, %v4861_v27, %v1367_v43  ;;  %v1443_v63 = vsel %vm3246_vm5, %v4862_v14, %v1368_v12  ;;  %v1289_v1 = vadd.f32 %v1204_v19, %v1097_v30  ;;  %v4878_v15 = vld [vmem:[#allocation23_spill] sm:$0xff] }
 0x20e   :  { %v1101_v32 = vmul.f32 %v4863_v60, %v2335_v54  ;;  %1507 = vst [vmem:[%s4174_s4 + $0x160] sm:$0xff] %v1442_v7  ;;  %1508 = vst.msk [vmem:[%s4174_s4 + $0x168] sm:$0xff] %vm1463_vm6, %v1443_v63  ;;  %v1294_v61 = vadd.f32 %v1216_v9, %v1102_v44  ;;  %v1295_v4 = vadd.f32 %v1216_v9, %v1103_v26  ;;  %v4873_v44 = vld [vmem:[#allocation67_spill] sm:$0xff]  ;;  %v4879_v7 = vld [vmem:[#allocation92_spill] sm:$0xff] }
 0x20f   :  { %v1106_v31 = vmul.f32 %v4864_v25, %v4671_v52  ;;  %v1107_v47 = vmul.f32 %v4864_v25, %v2335_v54  ;;  %v1365_v21 = vsel %vm3207_vm2, %v4865_v50, %v1288_v35  ;;  %v1366_v51 = vsel %vm3214_vm3, %v4866_v3, %v1289_v1  ;;  %v1220_v18 = vpop.permute.xlu1 %1219  ;;  %v4880_v9 = vld [vmem:[#allocation93_spill] sm:$0xff]  ;;  %v4884_v50 = vld [vmem:[#allocation152_spill] sm:$0xff]  ;;  %v4885_v3 = vld [vmem:[#allocation106_spill] sm:$0xff] }
 0x210   :  { %v1440_v22 = vsel %vm3239_vm4, %v4867_v6, %v1365_v21  ;;  %v1441_v45 = vsel %vm3246_vm5, %v4868_v57, %v1366_v51  ;;  %v1371_v20 = vsel %vm3207_vm2, %v3390_v55, %v1294_v61  ;;  %v1372_v53 = vsel %vm3214_vm3, %v3394_v41, %v1295_v4  ;;  %v1232_v27 = vpop.permute.xlu0 %1231  ;;  %v4882_v4 = vld [vmem:[#allocation100_spill] sm:$0xff]  ;;  %v4886_v6 = vld [vmem:[#allocation107_spill] sm:$0xff] }
 0x211   :  { %1505 = vst [vmem:[%s4174_s4 + $0x150] sm:$0xff] %v1440_v22  ;;  %1506 = vst.msk [vmem:[%s4174_s4 + $0x158] sm:$0xff] %vm1463_vm6, %v1441_v45  ;;  %v1446_v24 = vsel %vm3239_vm4, %v4869_v40, %v1371_v20  ;;  %v1447_v55 = vsel %vm3246_vm5, %v4870_v56, %v1372_v53  ;;  %v1292_v58 = vadd.f32 %v1212_v5, %v1100_v48  ;;  %v4887_v45 = vld [vmem:[#allocation24_spill] sm:$0xff]  ;;  %v4888_v53 = vld [vmem:[#allocation27_spill] sm:$0xff] }
 0x212   :  { %v1293_v41 = vadd.f32 %v1212_v5, %v1101_v32  ;;  %v1104_v49 = vmul.f32 %v4871_v33, %v4671_v52  ;;  %v1105_v46 = vmul.f32 %v4871_v33, %v2335_v54  ;;  %1511 = vst [vmem:[%s4174_s4 + $0x180] sm:$0xff] %v1446_v24  ;;  %1512 = vst.msk [vmem:[%s4174_s4 + $0x188] sm:$0xff] %vm1463_vm6, %v1447_v55  ;;  %v4881_v32 = vld [vmem:[#allocation99_spill] sm:$0xff] }
 0x213   :  { %v1298_v34 = vadd.f32 %v1224_v29, %v1106_v31  ;;  %v1299_v11 = vadd.f32 %v1224_v29, %v1107_v47  ;;  %v1110_v30 = vmul.f32 %v4872_v23, %v4671_v52  ;;  %v1111_v62 = vmul.f32 %v4872_v23, %v2335_v54  ;;  %v4883_v31 = vld [vmem:[#allocation69_spill] sm:$0xff]  ;;  %v1228_v57 = vpop.permute.xlu1 %1227  ;;  %v4889_v55 = vld [vmem:[#allocation83_spill] sm:$0xff]  ;;  %v4891_v29 = vld [vmem:[#allocation84_spill] sm:$0xff] }
 0x214   :  { %v1369_v42 = vsel %vm3207_vm2, %v3382_v39, %v1292_v58  ;;  %v1370_v2 = vsel %vm3214_vm3, %v3386_v0, %v1293_v41  ;;  %v4877_v0 = vld [vmem:[#allocation21_spill] sm:$0xff]  ;;  %v1296_v12 = vadd.f32 %v1220_v18, %v1104_v49  ;;  %v1297_v19 = vadd.f32 %v1220_v18, %v1105_v46  ;;  %v1240_v56 = vpop.permute.xlu0 %1239  ;;  %v4890_v58 = vld [vmem:[#allocation8_spill] sm:$0xff] }
 0x215   :  { %v1444_v26 = vsel %vm3239_vm4, %v4873_v44, %v1369_v42  ;;  %v1445_v8 = vsel %vm3246_vm5, %v4874_v28, %v1370_v2  ;;  %v1375_v10 = vsel %vm3207_vm2, %v4875_v36, %v1298_v34  ;;  %v1376_v39 = vsel %vm3214_vm3, %v4876_v37, %v1299_v11  ;;  %v4892_v34 = vld [vmem:[#allocation96_spill] sm:$0xff]  ;;  %v4894_v42 = vld [vmem:[#allocation105_spill] sm:$0xff]  ;;  %v4896_v28 = vld [vmem:[#allocation71_spill] sm:$0xff] }
 0x216   :  { %1509 = vst [vmem:[%s4174_s4 + $0x170] sm:$0xff] %v1444_v26  ;;  %1510 = vst.msk [vmem:[%s4174_s4 + $0x178] sm:$0xff] %vm1463_vm6, %v1445_v8  ;;  %v1450_v16 = vsel %vm3239_vm4, %v4877_v0, %v1375_v10  ;;  %v1451_v43 = vsel %vm3246_vm5, %v4878_v15, %v1376_v39  ;;  %v1108_v14 = vmul.f32 %v4879_v7, %v4671_v52  ;;  %v4895_v44 = vld [vmem:[#allocation20_spill] sm:$0xff]  ;;  %v4897_v39 = vld [vmem:[#allocation73_spill] sm:$0xff] }
 0x217   :  { %v1109_v63 = vmul.f32 %v4879_v7, %v2335_v54  ;;  %1515 = vst [vmem:[%s4174_s4 + $0x1a0] sm:$0xff] %v1450_v16  ;;  %1516 = vst.msk [vmem:[%s4174_s4 + $0x1a8] sm:$0xff] %vm1463_vm6, %v1451_v43  ;;  %v1302_v35 = vadd.f32 %v1232_v27, %v1110_v30  ;;  %v1303_v1 = vadd.f32 %v1232_v27, %v1111_v62  ;;  %v4893_v30 = vld [vmem:[#allocation104_spill] sm:$0xff]  ;;  %v1236_v37 = vpop.permute.xlu1 %1235  ;;  %v4901_v7 = vld [vmem:[#allocation26_spill] sm:$0xff] }
 0x218   :  { %v1114_v60 = vmul.f32 %v4880_v9, %v4671_v52  ;;  %v1115_v48 = vmul.f32 %v4880_v9, %v2335_v54  ;;  %v1373_v61 = vsel %vm3207_vm2, %v4881_v32, %v1296_v12  ;;  %v1374_v25 = vsel %vm3214_vm3, %v4882_v4, %v1297_v19  ;;  %v4898_v0 = vld [vmem:[#allocation28_spill] sm:$0xff]  ;;  %v4899_v12 = vld [vmem:[#allocation25_spill] sm:$0xff] }
 0x219   :  { %v1448_v47 = vsel %vm3239_vm4, %v4883_v31, %v1373_v61  ;;  %v1449_v21 = vsel %vm3246_vm5, %v4884_v50, %v1374_v25  ;;  %v1379_v51 = vsel %vm3207_vm2, %v4885_v3, %v1302_v35  ;;  %v1380_v22 = vsel %vm3214_vm3, %v4886_v6, %v1303_v1  ;;  %v4900_v19 = vld [vmem:[#allocation9_spill] sm:$0xff]  ;;  %v4905_v61 = vld [vmem:[#allocation43_spill] sm:$0xff] }
 0x21a   :  { %1513 = vst [vmem:[%s4174_s4 + $0x190] sm:$0xff] %v1448_v47  ;;  %1514 = vst.msk [vmem:[%s4174_s4 + $0x198] sm:$0xff] %vm1463_vm6, %v1449_v21  ;;  %v1454_v20 = vsel %vm3239_vm4, %v4887_v45, %v1379_v51  ;;  %v1455_v5 = vsel %vm3246_vm5, %v4888_v53, %v1380_v22  ;;  %v1300_v40 = vadd.f32 %v1228_v57, %v1108_v14  ;;  %v4903_v9 = vld [vmem:[#allocation129_spill] sm:$0xff]  ;;  %v4906_v3 = vld [vmem:[#allocation11_spill] sm:$0xff] }
 0x21b   :  { %v1301_v24 = vadd.f32 %v1228_v57, %v1109_v63  ;;  %v922_v41 = vadd.f32 %v4890_v58, %v4889_v55  ;;  %v923_v33 = vadd.f32 %v4890_v58, %v4891_v29  ;;  %1519 = vst [vmem:[%s4174_s4 + $0x1c0] sm:$0xff] %v1454_v20  ;;  %1520 = vst.msk [vmem:[%s4174_s4 + $0x1c8] sm:$0xff] %vm1463_vm6, %v1455_v5  ;;  %v4902_v63 = vld [vmem:[#allocation101_spill] sm:$0xff]  ;;  %v1244_v50 = vpop.permute.xlu1 %1243  ;;  %v4907_v6 = vld [vmem:[#allocation131_spill] sm:$0xff] }
 0x21c   :  { %v1306_v49 = vadd.f32 %v1240_v56, %v1114_v60  ;;  %v1307_v46 = vadd.f32 %v1240_v56, %v1115_v48  ;;  %v1112_v11 = vmul.f32 %v4892_v34, %v4671_v52  ;;  %v1113_v23 = vmul.f32 %v4892_v34, %v2335_v54  ;;  %v4904_v48 = vld [vmem:[#allocation130_spill] sm:$0xff]  ;;  %v4908_v57 = vld [vmem:[#allocation132_spill] sm:$0xff] }
 0x21d   :  { %v1377_v62 = vsel %vm3207_vm2, %v4893_v30, %v1300_v40  ;;  %v1378_v2 = vsel %vm3214_vm3, %v4894_v42, %v1301_v24  ;;  %v536_v27 = vadd.f32 %v4900_v19, %v4899_v12  ;;  %v537_v14 = vadd.f32 %v4900_v19, %v4901_v7 }
 0x21e   :  { %v1452_v26 = vsel %vm3239_vm4, %v4895_v44, %v1377_v62  ;;  %v1453_v8 = vsel %vm3246_vm5, %v4896_v28, %v1378_v2  ;;  %v1383_v36 = vsel %vm3207_vm2, %v922_v41, %v1306_v49  ;;  %v1384_v10 = vsel %vm3214_vm3, %v923_v33, %v1307_v46 }
 0x21f   :  { %1517 = vst [vmem:[%s4174_s4 + $0x1b0] sm:$0xff] %v1452_v26  ;;  %1518 = vst.msk [vmem:[%s4174_s4 + $0x1b8] sm:$0xff] %vm1463_vm6, %v1453_v8  ;;  %v1458_v18 = vsel %vm3239_vm4, %v4897_v39, %v1383_v36  ;;  %v1459_v16 = vsel %vm3246_vm5, %v4898_v0, %v1384_v10  ;;  %v1304_v15 = vadd.f32 %v1236_v37, %v1112_v11 }
 0x220   :  { %v1305_v43 = vadd.f32 %v1236_v37, %v1113_v23  ;;  %1523 = vst [vmem:[%s4174_s4 + $0x1e0] sm:$0xff] %v1458_v18  ;;  %1524 = vst.msk [vmem:[%s4174_s4 + $0x1e8] sm:$0xff] %vm1463_vm6, %v1459_v16  ;;  %v1116_v35 = vmul.f32 %v4902_v63, %v4671_v52  ;;  %v1117_v1 = vmul.f32 %v4902_v63, %v2335_v54 }
 0x221   :  { %v1381_v60 = vsel %vm3207_vm2, %v4903_v9, %v1304_v15  ;;  %v316_v4 = vmul.f32 %v4671_v52, %v4905_v61  ;;  %v317_v25 = vmul.f32 %v2335_v54, %v4905_v61 }
 0x222   :  { %v1382_v32 = vsel %vm3214_vm3, %v4904_v48, %v1305_v43  ;;  %v1456_v31 = vsel %vm3239_vm4, %v536_v27, %v1381_v60  ;;  %v1308_v52 = vadd.f32 %v1244_v50, %v1116_v35  ;;  %v1309_v21 = vadd.f32 %v1244_v50, %v1117_v1 }
 0x223   :  { %v1457_v47 = vsel %vm3246_vm5, %v537_v14, %v1382_v32  ;;  %1521 = vst [vmem:[%s4174_s4 + $0x1d0] sm:$0xff] %v1456_v31  ;;  %v540_v54 = vadd.f32 %v4906_v3, %v316_v4  ;;  %v541_v51 = vadd.f32 %v4906_v3, %v317_v25 }
 0x224   :  { %1522 = vst.msk [vmem:[%s4174_s4 + $0x1d8] sm:$0xff] %vm1463_vm6, %v1457_v47  ;;  %v1385_v22 = vsel %vm3207_vm2, %v4907_v6, %v1308_v52  ;;  %v1386_v45 = vsel %vm3214_vm3, %v4908_v57, %v1309_v21 }
 0x225   :  { %v1460_v20 = vsel %vm3239_vm4, %v540_v54, %v1385_v22  ;;  %v1461_v53 = vsel %vm3246_vm5, %v541_v51, %v1386_v45 }
 0x226   :  { %1525 = vst [vmem:[%s4174_s4 + $0x1f0] sm:$0xff] %v1460_v20  ;;  %1526 = vst.msk [vmem:[%s4174_s4 + $0x1f8] sm:$0xff] %vm1463_vm6, %v1461_v53 }

</bundles_post_ra>
